<compile_context>
chip_gen: v6e
topology: v6e:2x2x1
jax: 0.10.0
libtpu: 0.0.40
codegen_flags: <defaults>
</compile_context>

<pallas_src>
import jax
import jax.numpy as jnp
import numpy as np
from jax.experimental import pallas as pl
from jax.experimental.pallas import tpu as pltpu


# ----------------------------------------------------------------------------- kernel


def elmo_kernel(emb_ref, wih_ref, whh_ref, b_ref, scale_ref, out_ref):
    B, T, E = emb_ref.shape
    H2 = whh_ref.shape[0]          # 2H  (== E)
    H = H2 // 2
    G = whh_ref.shape[1]           # 8H

    emb = emb_ref[...]                               # (B, T, E) f32
    emb_bf = emb.astype(jnp.bfloat16)
    wih = wih_ref[...]                               # (E, 8H)   bf16, gates interleaved
    whh = whh_ref[...]                               # (2H, 8H)  bf16, block-diagonal
    bias = b_ref[...]                                # (1, 8H)   f32 (= b_ih + b_hh, both dirs)
    gs0 = scale_ref[0]                               # gamma * s0
    gs1 = scale_ref[1]                               # gamma * s1

    # Fused input projection: both directions, all gates, all timesteps in one matmul.
    pre = (jnp.dot(emb_bf.reshape(B * T, E), wih,
                   preferred_element_type=jnp.float32) + bias).reshape(B, T, G)

    # Lane masks (computed once, hoisted out of the loops).
    lane_g = jax.lax.broadcasted_iota(jnp.int32, (1, G), 1)
    bwd_gate_mask = (lane_g % H2) >= H               # backward lanes within each gate pair
    bwd_half_mask = jax.lax.broadcasted_iota(jnp.int32, (1, H2), 1) >= H

    # Fused bidirectional recurrence: state = [h_fwd | h_bwd].  One matmul per step
    # handles forward time s and backward time T-1-s simultaneously.
    h = jnp.zeros((B, H2), jnp.float32)
    c = jnp.zeros((B, H2), jnp.float32)
    h_steps = []
    # NOTE: T is small and static; the unrolled Python loop gives the LLO scheduler
    # full visibility.  TODO(synk): for long sequences switch to lax.fori_loop with a
    # VMEM scratch slab instead of keeping all T states live.
    for s in range(T):
        pre_s = jnp.where(bwd_gate_mask, pre[:, T - 1 - s, :], pre[:, s, :])   # (B, 8H)
        gates = pre_s + jnp.dot(h.astype(jnp.bfloat16), whh,
                                preferred_element_type=jnp.float32)            # (B, 8H)
        i_g = jax.nn.sigmoid(gates[:, 0:H2])          # 128-lane-aligned slices
        f_g = jax.nn.sigmoid(gates[:, H2:2 * H2])
        g_g = jnp.tanh(gates[:, 2 * H2:3 * H2])
        o_g = jax.nn.sigmoid(gates[:, 3 * H2:4 * H2])
        c = f_g * c + i_g * g_g
        h = o_g * jnp.tanh(c)
        h_steps.append(h)

    # Time-align the bidirectional output:
    #   lstm_out[:, t, :H] = forward hidden at time t     (fused step t)
    #   lstm_out[:, t, H:] = backward hidden at time t    (fused step T-1-t)
    rows = [jnp.where(bwd_half_mask, h_steps[T - 1 - t], h_steps[t]) for t in range(T)]
    lstm_out = jnp.stack(rows, axis=1)                # (B, T, 2H) == (B, T, E)

    # Single lane-dense slab store: gamma * (s0*emb + s1*lstm_out).
    out_ref[...] = gs0 * emb + gs1 * lstm_out


# ----------------------------------------------------------------------------- wrapper


def _interleave_gates(wf_T, wb_T, H):
    """Interleave per-gate column blocks of two (rows, 4H) matrices -> (rows, 8H)."""
    rows = wf_T.shape[0]
    a = wf_T.reshape(rows, 4, H)
    b = wb_T.reshape(rows, 4, H)
    return jnp.stack([a, b], axis=2).reshape(rows, 8 * H)


def pack_params(raw):
    """Build the fused / pre-transposed / bf16 kernel parameters from raw params."""
    H = raw["whh_f"].shape[1]
    E = raw["wih_f"].shape[1]
    assert E == 2 * H, "ELMo residual/mix requires embedding_dim == 2*hidden_size"

    # Input projection: (E, 8H), both directions fused, gates interleaved.
    wih_cat = _interleave_gates(raw["wih_f"].T, raw["wih_b"].T, H)           # (E, 8H)

    # Recurrent: block-diagonal (2H, 8H); h_f only feeds forward gates, h_b backward.
    zeros = jnp.zeros((H, 4 * H), jnp.float32)
    whh_top = _interleave_gates(raw["whh_f"].T, zeros, H)                    # (H, 8H)
    whh_bot = _interleave_gates(zeros, raw["whh_b"].T, H)                    # (H, 8H)
    whh_cat = jnp.concatenate([whh_top, whh_bot], axis=0)                    # (2H, 8H)

    b_cat = _interleave_gates(raw["b_f"], raw["b_b"], H)                     # (1, 8H)

    scale = jnp.array([raw["gamma"][0] * raw["s"][0],
                       raw["gamma"][0] * raw["s"][1]], jnp.float32)

    return dict(
        emb_table=raw["emb_table"].astype(jnp.float32),
        wih_cat=wih_cat.astype(jnp.bfloat16),
        whh_cat=whh_cat.astype(jnp.bfloat16),
        b_cat=b_cat.astype(jnp.float32),
        scale=scale,
    )


def elmo_forward(pieces, packed, *, batch_block=None):
    # Embedding gather in plain XLA (padding_idx row of the table is zero).
    emb = jnp.take(packed["emb_table"], pieces, axis=0).astype(jnp.float32)   # (B, T, E)
    B, T, E = emb.shape
    H2, G = packed["whh_cat"].shape

    if batch_block is None:
        batch_block = B                       # toy sizes: whole batch in one program
    assert B % batch_block == 0
    grid = (B // batch_block,)

    ret = pl.pallas_call(
        elmo_kernel,
        out_shape=jax.ShapeDtypeStruct((B, T, E), jnp.float32),
        grid=grid,
        in_specs=[
            pl.BlockSpec((batch_block, T, E), lambda b: (b, 0, 0)),
            pl.BlockSpec((E, G), lambda b: (0, 0)),
            pl.BlockSpec((H2, G), lambda b: (0, 0)),
            pl.BlockSpec((1, G), lambda b: (0, 0)),
            pl.BlockSpec((2,), lambda b: (0,),
                         memory_space=pltpu.MemorySpace.SMEM),
        ],
        out_specs=pl.BlockSpec((batch_block, T, E), lambda b: (b, 0, 0)),
        compiler_params=pltpu.CompilerParams(
            dimension_semantics=("parallel",)),
    )(emb, packed["wih_cat"], packed["whh_cat"], packed["b_cat"], packed["scale"])

    # torch.cat((embedded, gamma * ret), 1) — free layout op in XLA.
    return jnp.concatenate([emb, ret], axis=1)


# ----------------------------------------------------------------------------- params / reference


def init_raw_params(key, V, E, H, padding_idx=0):
    ks = jax.random.split(key, 10)
    scale = 0.1
    emb_table = scale * jax.random.normal(ks[0], (V, E), jnp.float32)
    emb_table = emb_table.at[padding_idx].set(0.0)   # padding_idx row is zero in nn.Embedding
    wih_f = scale * jax.random.normal(ks[1], (4 * H, E), jnp.float32)
    whh_f = scale * jax.random.normal(ks[2], (4 * H, H), jnp.float32)
    bih_f = scale * jax.random.normal(ks[3], (4 * H,), jnp.float32)
    bhh_f = scale * jax.random.normal(ks[4], (4 * H,), jnp.float32)
    wih_b = scale * jax.random.normal(ks[5], (4 * H, E), jnp.float32)
    whh_b = scale * jax.random.normal(ks[6], (4 * H, H), jnp.float32)
    bih_b = scale * jax.random.normal(ks[7], (4 * H,), jnp.float32)
    bhh_b = scale * jax.random.normal(ks[8], (4 * H,), jnp.float32)
    s = jax.random.normal(ks[9], (2,), jnp.float32)          # s has 1 + lstm_layer_num entries
    gamma = jnp.array([0.5], jnp.float32)
    return dict(
        emb_table=emb_table,
        wih_f=wih_f, whh_f=whh_f, b_f=(bih_f + bhh_f).reshape(1, 4 * H),
        wih_b=wih_b, whh_b=whh_b, b_b=(bih_b + bhh_b).reshape(1, 4 * H),
        s=s, gamma=gamma,
    )


def elmo_reference(pieces, params):
    """Pure-JAX f32 reference of the PyTorch forward (lstm_layer_num=1)."""
    emb = params["emb_table"][pieces]
    B, T, E = emb.shape
    H = params["whh_f"].shape[1]

    def run_dir(wih, whh, b, reverse):
        pre = jnp.einsum("bte,ge->btg", emb, wih) + b.reshape(4 * H)
        h = jnp.zeros((B, H), jnp.float32)
        c = jnp.zeros((B, H), jnp.float32)
        hs = [None] * T
        order = range(T - 1, -1, -1) if reverse else range(T)
        for t in order:
            gates = pre[:, t, :] + h @ whh.T
            i = jax.nn.sigmoid(gates[:, :H])
            f = jax.nn.sigmoid(gates[:, H:2 * H])
            g = jnp.tanh(gates[:, 2 * H:3 * H])
            o = jax.nn.sigmoid(gates[:, 3 * H:])
            c = f * c + i * g
            h = o * jnp.tanh(c)
            hs[t] = h
        return jnp.stack(hs, axis=1)                          # (B, T, H)

    hf = run_dir(params["wih_f"], params["whh_f"], params["b_f"], False)
    hb = run_dir(params["wih_b"], params["whh_b"], params["b_b"], True)
    lstm_out = jnp.concatenate([hf, hb], axis=-1)             # (B, T, 2H)
    ret = params["s"][0] * emb + params["s"][1] * lstm_out
    return jnp.concatenate([emb, params["gamma"][0] * ret], axis=1)


# ----------------------------------------------------------------------------- main


if __name__ == "__main__":
    # vocab=50, embedding_dim=128, hidden_size=64 (E = 2H), lstm_layer_num=1,
    # batch=2, seq=8.
    V, E, H = 50, 128, 64
    B, T = 2, 8

    key = jax.random.PRNGKey(0)
    kp, kd = jax.random.split(key)
    raw = init_raw_params(kp, V, E, H, padding_idx=0)
    packed = pack_params(raw)
    pieces = jax.random.randint(kd, (B, T), 0, V, dtype=jnp.int32)

    out = elmo_forward(pieces, packed)
    out = jax.block_until_ready(out)

    assert out.shape == (B, 2 * T, E)
    ref = elmo_reference(pieces, raw)
    np.testing.assert_allclose(np.asarray(out), np.asarray(ref), atol=2e-2, rtol=2e-2)
    print("KERNEL_OK")
</pallas_src>

<mosaic_0001>
module attributes {stable_mosaic.version = 11 : i64} {
  func.func @elmo_kernel(%arg0: i32, %arg1: memref<2x8x128xf32, #tpu.memory_space<vmem>>, %arg2: memref<128x512xbf16, #tpu.memory_space<vmem>>, %arg3: memref<128x512xbf16, #tpu.memory_space<vmem>>, %arg4: memref<1x512xf32, #tpu.memory_space<vmem>>, %arg5: memref<2xf32, #tpu.memory_space<smem>>, %arg6: memref<2x8x128xf32, #tpu.memory_space<vmem>>) attributes {dimension_semantics = [#tpu.dimension_semantics<parallel>], iteration_bounds = array<i64: 1>, scalar_prefetch = 0 : i64, scratch_operands = 0 : i64, tpu.core_type = #tpu.core_type<tc>, window_params = [{transform_indices = @transform_0, window_bounds = array<i64: 2, 8, 128>}, {pipeline_mode = #tpu.pipeline_mode<synchronous>, transform_indices = @transform_1, window_bounds = array<i64: 128, 512>}, {pipeline_mode = #tpu.pipeline_mode<synchronous>, transform_indices = @transform_2, window_bounds = array<i64: 128, 512>}, {pipeline_mode = #tpu.pipeline_mode<synchronous>, transform_indices = @transform_3, window_bounds = array<i64: 1, 512>}, {transform_indices = @transform_4, window_bounds = array<i64: 2>}, {transform_indices = @transform_5, window_bounds = array<i64: 2, 8, 128>}]} {
    %c0 = arith.constant 0 : index
    %c0_0 = arith.constant 0 : index
    %c0_1 = arith.constant 0 : index
    %0 = vector.load %arg1[%c0, %c0_0, %c0_1] : memref<2x8x128xf32, #tpu.memory_space<vmem>>, vector<2x8x128xf32>
    %1 = arith.truncf %0 : vector<2x8x128xf32> to vector<2x8x128xbf16>
    %c0_2 = arith.constant 0 : index
    %c0_3 = arith.constant 0 : index
    %2 = vector.load %arg2[%c0_2, %c0_3] : memref<128x512xbf16, #tpu.memory_space<vmem>>, vector<128x512xbf16>
    %c0_4 = arith.constant 0 : index
    %c0_5 = arith.constant 0 : index
    %3 = vector.load %arg3[%c0_4, %c0_5] : memref<128x512xbf16, #tpu.memory_space<vmem>>, vector<128x512xbf16>
    %c0_6 = arith.constant 0 : index
    %c0_7 = arith.constant 0 : index
    %4 = vector.load %arg4[%c0_6, %c0_7] : memref<1x512xf32, #tpu.memory_space<vmem>>, vector<1x512xf32>
    %c0_8 = arith.constant 0 : index
    %5 = memref.load %arg5[%c0_8] : memref<2xf32, #tpu.memory_space<smem>>
    %c1 = arith.constant 1 : index
    %6 = memref.load %arg5[%c1] : memref<2xf32, #tpu.memory_space<smem>>
    %7 = vector.shape_cast %1 : vector<2x8x128xbf16> to vector<16x128xbf16>
    %cst = arith.constant dense<0.000000e+00> : vector<16x512xf32>
    %8 = tpu.matmul %7, %2, %cst {dimension_numbers = #tpu.dot_dimension_numbers<[1], [0], [0], [1], [0, 0, 1, 1], [], []>} : vector<16x128xbf16>, vector<128x512xbf16>, vector<16x512xf32> -> vector<16x512xf32>
    %9 = vector.broadcast %4 : vector<1x512xf32> to vector<16x512xf32>
    %10 = arith.addf %8, %9 : vector<16x512xf32>
    %11 = vector.shape_cast %10 : vector<16x512xf32> to vector<2x8x512xf32>
    %12 = tpu.iota {dimensions = array<i32: 1>} : vector<1x512xi32>
    %c128_i32 = arith.constant 128 : i32
    %c0_i32 = arith.constant 0 : i32
    %13 = arith.cmpi eq, %c128_i32, %c0_i32 : i32
    %c1_i32 = arith.constant 1 : i32
    %14 = arith.select %13, %c1_i32, %c128_i32 : i32
    %15 = vector.broadcast %14 : i32 to vector<1x512xi32>
    %16 = arith.remsi %12, %15 : vector<1x512xi32>
    %c0_i32_9 = arith.constant 0 : i32
    %17 = vector.broadcast %c0_i32_9 : i32 to vector<1x512xi32>
    %18 = arith.cmpi ne, %16, %17 : vector<1x512xi32>
    %c0_i32_10 = arith.constant 0 : i32
    %19 = vector.broadcast %c0_i32_10 : i32 to vector<1x512xi32>
    %20 = arith.cmpi slt, %16, %19 : vector<1x512xi32>
    %c0_i32_11 = arith.constant 0 : i32
    %21 = arith.cmpi slt, %14, %c0_i32_11 : i32
    %22 = vector.broadcast %21 : i1 to vector<1x512xi1>
    %23 = vector.broadcast %22 : vector<1x512xi1> to vector<1x512xi1>
    %24 = arith.xori %20, %23 : vector<1x512xi1>
    %25 = arith.andi %24, %18 : vector<1x512xi1>
    %26 = vector.broadcast %14 : i32 to vector<1x512xi32>
    %27 = arith.addi %16, %26 : vector<1x512xi32>
    %28 = arith.select %25, %27, %16 : vector<1x512xi1>, vector<1x512xi32>
    %c64_i32 = arith.constant 64 : i32
    %29 = vector.broadcast %c64_i32 : i32 to vector<1x512xi32>
    %30 = arith.cmpi sge, %28, %29 : vector<1x512xi32>
    %31 = tpu.iota {dimensions = array<i32: 1>} : vector<1x128xi32>
    %c64_i32_12 = arith.constant 64 : i32
    %32 = vector.broadcast %c64_i32_12 : i32 to vector<1x128xi32>
    %33 = arith.cmpi sge, %31, %32 : vector<1x128xi32>
    %cst_13 = arith.constant 0.000000e+00 : f32
    %34 = vector.broadcast %cst_13 : f32 to vector<2x128xf32>
    %cst_14 = arith.constant 0.000000e+00 : f32
    %35 = vector.broadcast %cst_14 : f32 to vector<2x128xf32>
    %36 = vector.extract_strided_slice %11 {offsets = [0, 7, 0], sizes = [2, 1, 512], strides = [1, 1, 1]} : vector<2x8x512xf32> to vector<2x1x512xf32>
    %37 = vector.shape_cast %36 : vector<2x1x512xf32> to vector<2x512xf32>
    %38 = vector.extract_strided_slice %11 {offsets = [0, 0, 0], sizes = [2, 1, 512], strides = [1, 1, 1]} : vector<2x8x512xf32> to vector<2x1x512xf32>
    %39 = vector.shape_cast %38 : vector<2x1x512xf32> to vector<2x512xf32>
    %40 = vector.shape_cast %30 : vector<1x512xi1> to vector<1x512xi1>
    %41 = vector.broadcast %40 : vector<1x512xi1> to vector<2x512xi1>
    %42 = arith.select %41, %37, %39 : vector<2x512xi1>, vector<2x512xf32>
    %43 = arith.truncf %34 : vector<2x128xf32> to vector<2x128xbf16>
    %cst_15 = arith.constant dense<0.000000e+00> : vector<2x512xf32>
    %44 = tpu.matmul %43, %3, %cst_15 {dimension_numbers = #tpu.dot_dimension_numbers<[1], [0], [0], [1], [0, 0, 1, 1], [], []>} : vector<2x128xbf16>, vector<128x512xbf16>, vector<2x512xf32> -> vector<2x512xf32>
    %45 = arith.addf %42, %44 : vector<2x512xf32>
    %46 = vector.extract_strided_slice %45 {offsets = [0, 0], sizes = [2, 128], strides = [1, 1]} : vector<2x512xf32> to vector<2x128xf32>
    %47 = arith.negf %46 : vector<2x128xf32>
    %48 = math.exp %47 : vector<2x128xf32>
    %cst_16 = arith.constant 1.000000e+00 : f32
    %49 = vector.broadcast %cst_16 : f32 to vector<2x128xf32>
    %50 = arith.addf %49, %48 : vector<2x128xf32>
    %51 = arith.divf %49, %50 : vector<2x128xf32>
    %52 = vector.extract_strided_slice %45 {offsets = [0, 128], sizes = [2, 128], strides = [1, 1]} : vector<2x512xf32> to vector<2x128xf32>
    %53 = arith.negf %52 : vector<2x128xf32>
    %54 = math.exp %53 : vector<2x128xf32>
    %cst_17 = arith.constant 1.000000e+00 : f32
    %55 = vector.broadcast %cst_17 : f32 to vector<2x128xf32>
    %56 = arith.addf %55, %54 : vector<2x128xf32>
    %57 = arith.divf %55, %56 : vector<2x128xf32>
    %58 = vector.extract_strided_slice %45 {offsets = [0, 256], sizes = [2, 128], strides = [1, 1]} : vector<2x512xf32> to vector<2x128xf32>
    %59 = math.tanh %58 : vector<2x128xf32>
    %60 = vector.extract_strided_slice %45 {offsets = [0, 384], sizes = [2, 128], strides = [1, 1]} : vector<2x512xf32> to vector<2x128xf32>
    %61 = arith.negf %60 : vector<2x128xf32>
    %62 = math.exp %61 : vector<2x128xf32>
    %cst_18 = arith.constant 1.000000e+00 : f32
    %63 = vector.broadcast %cst_18 : f32 to vector<2x128xf32>
    %64 = arith.addf %63, %62 : vector<2x128xf32>
    %65 = arith.divf %63, %64 : vector<2x128xf32>
    %66 = arith.mulf %57, %35 : vector<2x128xf32>
    %67 = arith.mulf %51, %59 : vector<2x128xf32>
    %68 = arith.addf %66, %67 : vector<2x128xf32>
    %69 = math.tanh %68 : vector<2x128xf32>
    %70 = arith.mulf %65, %69 : vector<2x128xf32>
    %71 = vector.extract_strided_slice %11 {offsets = [0, 6, 0], sizes = [2, 1, 512], strides = [1, 1, 1]} : vector<2x8x512xf32> to vector<2x1x512xf32>
    %72 = vector.shape_cast %71 : vector<2x1x512xf32> to vector<2x512xf32>
    %73 = vector.extract_strided_slice %11 {offsets = [0, 1, 0], sizes = [2, 1, 512], strides = [1, 1, 1]} : vector<2x8x512xf32> to vector<2x1x512xf32>
    %74 = vector.shape_cast %73 : vector<2x1x512xf32> to vector<2x512xf32>
    %75 = vector.shape_cast %30 : vector<1x512xi1> to vector<1x512xi1>
    %76 = vector.broadcast %75 : vector<1x512xi1> to vector<2x512xi1>
    %77 = arith.select %76, %72, %74 : vector<2x512xi1>, vector<2x512xf32>
    %78 = arith.truncf %70 : vector<2x128xf32> to vector<2x128xbf16>
    %cst_19 = arith.constant dense<0.000000e+00> : vector<2x512xf32>
    %79 = tpu.matmul %78, %3, %cst_19 {dimension_numbers = #tpu.dot_dimension_numbers<[1], [0], [0], [1], [0, 0, 1, 1], [], []>} : vector<2x128xbf16>, vector<128x512xbf16>, vector<2x512xf32> -> vector<2x512xf32>
    %80 = arith.addf %77, %79 : vector<2x512xf32>
    %81 = vector.extract_strided_slice %80 {offsets = [0, 0], sizes = [2, 128], strides = [1, 1]} : vector<2x512xf32> to vector<2x128xf32>
    %82 = arith.negf %81 : vector<2x128xf32>
    %83 = math.exp %82 : vector<2x128xf32>
    %cst_20 = arith.constant 1.000000e+00 : f32
    %84 = vector.broadcast %cst_20 : f32 to vector<2x128xf32>
    %85 = arith.addf %84, %83 : vector<2x128xf32>
    %86 = arith.divf %84, %85 : vector<2x128xf32>
    %87 = vector.extract_strided_slice %80 {offsets = [0, 128], sizes = [2, 128], strides = [1, 1]} : vector<2x512xf32> to vector<2x128xf32>
    %88 = arith.negf %87 : vector<2x128xf32>
    %89 = math.exp %88 : vector<2x128xf32>
    %cst_21 = arith.constant 1.000000e+00 : f32
    %90 = vector.broadcast %cst_21 : f32 to vector<2x128xf32>
    %91 = arith.addf %90, %89 : vector<2x128xf32>
    %92 = arith.divf %90, %91 : vector<2x128xf32>
    %93 = vector.extract_strided_slice %80 {offsets = [0, 256], sizes = [2, 128], strides = [1, 1]} : vector<2x512xf32> to vector<2x128xf32>
    %94 = math.tanh %93 : vector<2x128xf32>
    %95 = vector.extract_strided_slice %80 {offsets = [0, 384], sizes = [2, 128], strides = [1, 1]} : vector<2x512xf32> to vector<2x128xf32>
    %96 = arith.negf %95 : vector<2x128xf32>
    %97 = math.exp %96 : vector<2x128xf32>
    %cst_22 = arith.constant 1.000000e+00 : f32
    %98 = vector.broadcast %cst_22 : f32 to vector<2x128xf32>
    %99 = arith.addf %98, %97 : vector<2x128xf32>
    %100 = arith.divf %98, %99 : vector<2x128xf32>
    %101 = arith.mulf %92, %68 : vector<2x128xf32>
    %102 = arith.mulf %86, %94 : vector<2x128xf32>
    %103 = arith.addf %101, %102 : vector<2x128xf32>
    %104 = math.tanh %103 : vector<2x128xf32>
    %105 = arith.mulf %100, %104 : vector<2x128xf32>
    %106 = vector.extract_strided_slice %11 {offsets = [0, 5, 0], sizes = [2, 1, 512], strides = [1, 1, 1]} : vector<2x8x512xf32> to vector<2x1x512xf32>
    %107 = vector.shape_cast %106 : vector<2x1x512xf32> to vector<2x512xf32>
    %108 = vector.extract_strided_slice %11 {offsets = [0, 2, 0], sizes = [2, 1, 512], strides = [1, 1, 1]} : vector<2x8x512xf32> to vector<2x1x512xf32>
    %109 = vector.shape_cast %108 : vector<2x1x512xf32> to vector<2x512xf32>
    %110 = vector.shape_cast %30 : vector<1x512xi1> to vector<1x512xi1>
    %111 = vector.broadcast %110 : vector<1x512xi1> to vector<2x512xi1>
    %112 = arith.select %111, %107, %109 : vector<2x512xi1>, vector<2x512xf32>
    %113 = arith.truncf %105 : vector<2x128xf32> to vector<2x128xbf16>
    %cst_23 = arith.constant dense<0.000000e+00> : vector<2x512xf32>
    %114 = tpu.matmul %113, %3, %cst_23 {dimension_numbers = #tpu.dot_dimension_numbers<[1], [0], [0], [1], [0, 0, 1, 1], [], []>} : vector<2x128xbf16>, vector<128x512xbf16>, vector<2x512xf32> -> vector<2x512xf32>
    %115 = arith.addf %112, %114 : vector<2x512xf32>
    %116 = vector.extract_strided_slice %115 {offsets = [0, 0], sizes = [2, 128], strides = [1, 1]} : vector<2x512xf32> to vector<2x128xf32>
    %117 = arith.negf %116 : vector<2x128xf32>
    %118 = math.exp %117 : vector<2x128xf32>
    %cst_24 = arith.constant 1.000000e+00 : f32
    %119 = vector.broadcast %cst_24 : f32 to vector<2x128xf32>
    %120 = arith.addf %119, %118 : vector<2x128xf32>
    %121 = arith.divf %119, %120 : vector<2x128xf32>
    %122 = vector.extract_strided_slice %115 {offsets = [0, 128], sizes = [2, 128], strides = [1, 1]} : vector<2x512xf32> to vector<2x128xf32>
    %123 = arith.negf %122 : vector<2x128xf32>
    %124 = math.exp %123 : vector<2x128xf32>
    %cst_25 = arith.constant 1.000000e+00 : f32
    %125 = vector.broadcast %cst_25 : f32 to vector<2x128xf32>
    %126 = arith.addf %125, %124 : vector<2x128xf32>
    %127 = arith.divf %125, %126 : vector<2x128xf32>
    %128 = vector.extract_strided_slice %115 {offsets = [0, 256], sizes = [2, 128], strides = [1, 1]} : vector<2x512xf32> to vector<2x128xf32>
    %129 = math.tanh %128 : vector<2x128xf32>
    %130 = vector.extract_strided_slice %115 {offsets = [0, 384], sizes = [2, 128], strides = [1, 1]} : vector<2x512xf32> to vector<2x128xf32>
    %131 = arith.negf %130 : vector<2x128xf32>
    %132 = math.exp %131 : vector<2x128xf32>
    %cst_26 = arith.constant 1.000000e+00 : f32
    %133 = vector.broadcast %cst_26 : f32 to vector<2x128xf32>
    %134 = arith.addf %133, %132 : vector<2x128xf32>
    %135 = arith.divf %133, %134 : vector<2x128xf32>
    %136 = arith.mulf %127, %103 : vector<2x128xf32>
    %137 = arith.mulf %121, %129 : vector<2x128xf32>
    %138 = arith.addf %136, %137 : vector<2x128xf32>
    %139 = math.tanh %138 : vector<2x128xf32>
    %140 = arith.mulf %135, %139 : vector<2x128xf32>
    %141 = vector.extract_strided_slice %11 {offsets = [0, 4, 0], sizes = [2, 1, 512], strides = [1, 1, 1]} : vector<2x8x512xf32> to vector<2x1x512xf32>
    %142 = vector.shape_cast %141 : vector<2x1x512xf32> to vector<2x512xf32>
    %143 = vector.extract_strided_slice %11 {offsets = [0, 3, 0], sizes = [2, 1, 512], strides = [1, 1, 1]} : vector<2x8x512xf32> to vector<2x1x512xf32>
    %144 = vector.shape_cast %143 : vector<2x1x512xf32> to vector<2x512xf32>
    %145 = vector.shape_cast %30 : vector<1x512xi1> to vector<1x512xi1>
    %146 = vector.broadcast %145 : vector<1x512xi1> to vector<2x512xi1>
    %147 = arith.select %146, %142, %144 : vector<2x512xi1>, vector<2x512xf32>
    %148 = arith.truncf %140 : vector<2x128xf32> to vector<2x128xbf16>
    %cst_27 = arith.constant dense<0.000000e+00> : vector<2x512xf32>
    %149 = tpu.matmul %148, %3, %cst_27 {dimension_numbers = #tpu.dot_dimension_numbers<[1], [0], [0], [1], [0, 0, 1, 1], [], []>} : vector<2x128xbf16>, vector<128x512xbf16>, vector<2x512xf32> -> vector<2x512xf32>
    %150 = arith.addf %147, %149 : vector<2x512xf32>
    %151 = vector.extract_strided_slice %150 {offsets = [0, 0], sizes = [2, 128], strides = [1, 1]} : vector<2x512xf32> to vector<2x128xf32>
    %152 = arith.negf %151 : vector<2x128xf32>
    %153 = math.exp %152 : vector<2x128xf32>
    %cst_28 = arith.constant 1.000000e+00 : f32
    %154 = vector.broadcast %cst_28 : f32 to vector<2x128xf32>
    %155 = arith.addf %154, %153 : vector<2x128xf32>
    %156 = arith.divf %154, %155 : vector<2x128xf32>
    %157 = vector.extract_strided_slice %150 {offsets = [0, 128], sizes = [2, 128], strides = [1, 1]} : vector<2x512xf32> to vector<2x128xf32>
    %158 = arith.negf %157 : vector<2x128xf32>
    %159 = math.exp %158 : vector<2x128xf32>
    %cst_29 = arith.constant 1.000000e+00 : f32
    %160 = vector.broadcast %cst_29 : f32 to vector<2x128xf32>
    %161 = arith.addf %160, %159 : vector<2x128xf32>
    %162 = arith.divf %160, %161 : vector<2x128xf32>
    %163 = vector.extract_strided_slice %150 {offsets = [0, 256], sizes = [2, 128], strides = [1, 1]} : vector<2x512xf32> to vector<2x128xf32>
    %164 = math.tanh %163 : vector<2x128xf32>
    %165 = vector.extract_strided_slice %150 {offsets = [0, 384], sizes = [2, 128], strides = [1, 1]} : vector<2x512xf32> to vector<2x128xf32>
    %166 = arith.negf %165 : vector<2x128xf32>
    %167 = math.exp %166 : vector<2x128xf32>
    %cst_30 = arith.constant 1.000000e+00 : f32
    %168 = vector.broadcast %cst_30 : f32 to vector<2x128xf32>
    %169 = arith.addf %168, %167 : vector<2x128xf32>
    %170 = arith.divf %168, %169 : vector<2x128xf32>
    %171 = arith.mulf %162, %138 : vector<2x128xf32>
    %172 = arith.mulf %156, %164 : vector<2x128xf32>
    %173 = arith.addf %171, %172 : vector<2x128xf32>
    %174 = math.tanh %173 : vector<2x128xf32>
    %175 = arith.mulf %170, %174 : vector<2x128xf32>
    %176 = vector.extract_strided_slice %11 {offsets = [0, 3, 0], sizes = [2, 1, 512], strides = [1, 1, 1]} : vector<2x8x512xf32> to vector<2x1x512xf32>
    %177 = vector.shape_cast %176 : vector<2x1x512xf32> to vector<2x512xf32>
    %178 = vector.extract_strided_slice %11 {offsets = [0, 4, 0], sizes = [2, 1, 512], strides = [1, 1, 1]} : vector<2x8x512xf32> to vector<2x1x512xf32>
    %179 = vector.shape_cast %178 : vector<2x1x512xf32> to vector<2x512xf32>
    %180 = vector.shape_cast %30 : vector<1x512xi1> to vector<1x512xi1>
    %181 = vector.broadcast %180 : vector<1x512xi1> to vector<2x512xi1>
    %182 = arith.select %181, %177, %179 : vector<2x512xi1>, vector<2x512xf32>
    %183 = arith.truncf %175 : vector<2x128xf32> to vector<2x128xbf16>
    %cst_31 = arith.constant dense<0.000000e+00> : vector<2x512xf32>
    %184 = tpu.matmul %183, %3, %cst_31 {dimension_numbers = #tpu.dot_dimension_numbers<[1], [0], [0], [1], [0, 0, 1, 1], [], []>} : vector<2x128xbf16>, vector<128x512xbf16>, vector<2x512xf32> -> vector<2x512xf32>
    %185 = arith.addf %182, %184 : vector<2x512xf32>
    %186 = vector.extract_strided_slice %185 {offsets = [0, 0], sizes = [2, 128], strides = [1, 1]} : vector<2x512xf32> to vector<2x128xf32>
    %187 = arith.negf %186 : vector<2x128xf32>
    %188 = math.exp %187 : vector<2x128xf32>
    %cst_32 = arith.constant 1.000000e+00 : f32
    %189 = vector.broadcast %cst_32 : f32 to vector<2x128xf32>
    %190 = arith.addf %189, %188 : vector<2x128xf32>
    %191 = arith.divf %189, %190 : vector<2x128xf32>
    %192 = vector.extract_strided_slice %185 {offsets = [0, 128], sizes = [2, 128], strides = [1, 1]} : vector<2x512xf32> to vector<2x128xf32>
    %193 = arith.negf %192 : vector<2x128xf32>
    %194 = math.exp %193 : vector<2x128xf32>
    %cst_33 = arith.constant 1.000000e+00 : f32
    %195 = vector.broadcast %cst_33 : f32 to vector<2x128xf32>
    %196 = arith.addf %195, %194 : vector<2x128xf32>
    %197 = arith.divf %195, %196 : vector<2x128xf32>
    %198 = vector.extract_strided_slice %185 {offsets = [0, 256], sizes = [2, 128], strides = [1, 1]} : vector<2x512xf32> to vector<2x128xf32>
    %199 = math.tanh %198 : vector<2x128xf32>
    %200 = vector.extract_strided_slice %185 {offsets = [0, 384], sizes = [2, 128], strides = [1, 1]} : vector<2x512xf32> to vector<2x128xf32>
    %201 = arith.negf %200 : vector<2x128xf32>
    %202 = math.exp %201 : vector<2x128xf32>
    %cst_34 = arith.constant 1.000000e+00 : f32
    %203 = vector.broadcast %cst_34 : f32 to vector<2x128xf32>
    %204 = arith.addf %203, %202 : vector<2x128xf32>
    %205 = arith.divf %203, %204 : vector<2x128xf32>
    %206 = arith.mulf %197, %173 : vector<2x128xf32>
    %207 = arith.mulf %191, %199 : vector<2x128xf32>
    %208 = arith.addf %206, %207 : vector<2x128xf32>
    %209 = math.tanh %208 : vector<2x128xf32>
    %210 = arith.mulf %205, %209 : vector<2x128xf32>
    %211 = vector.extract_strided_slice %11 {offsets = [0, 2, 0], sizes = [2, 1, 512], strides = [1, 1, 1]} : vector<2x8x512xf32> to vector<2x1x512xf32>
    %212 = vector.shape_cast %211 : vector<2x1x512xf32> to vector<2x512xf32>
    %213 = vector.extract_strided_slice %11 {offsets = [0, 5, 0], sizes = [2, 1, 512], strides = [1, 1, 1]} : vector<2x8x512xf32> to vector<2x1x512xf32>
    %214 = vector.shape_cast %213 : vector<2x1x512xf32> to vector<2x512xf32>
    %215 = vector.shape_cast %30 : vector<1x512xi1> to vector<1x512xi1>
    %216 = vector.broadcast %215 : vector<1x512xi1> to vector<2x512xi1>
    %217 = arith.select %216, %212, %214 : vector<2x512xi1>, vector<2x512xf32>
    %218 = arith.truncf %210 : vector<2x128xf32> to vector<2x128xbf16>
    %cst_35 = arith.constant dense<0.000000e+00> : vector<2x512xf32>
    %219 = tpu.matmul %218, %3, %cst_35 {dimension_numbers = #tpu.dot_dimension_numbers<[1], [0], [0], [1], [0, 0, 1, 1], [], []>} : vector<2x128xbf16>, vector<128x512xbf16>, vector<2x512xf32> -> vector<2x512xf32>
    %220 = arith.addf %217, %219 : vector<2x512xf32>
    %221 = vector.extract_strided_slice %220 {offsets = [0, 0], sizes = [2, 128], strides = [1, 1]} : vector<2x512xf32> to vector<2x128xf32>
    %222 = arith.negf %221 : vector<2x128xf32>
    %223 = math.exp %222 : vector<2x128xf32>
    %cst_36 = arith.constant 1.000000e+00 : f32
    %224 = vector.broadcast %cst_36 : f32 to vector<2x128xf32>
    %225 = arith.addf %224, %223 : vector<2x128xf32>
    %226 = arith.divf %224, %225 : vector<2x128xf32>
    %227 = vector.extract_strided_slice %220 {offsets = [0, 128], sizes = [2, 128], strides = [1, 1]} : vector<2x512xf32> to vector<2x128xf32>
    %228 = arith.negf %227 : vector<2x128xf32>
    %229 = math.exp %228 : vector<2x128xf32>
    %cst_37 = arith.constant 1.000000e+00 : f32
    %230 = vector.broadcast %cst_37 : f32 to vector<2x128xf32>
    %231 = arith.addf %230, %229 : vector<2x128xf32>
    %232 = arith.divf %230, %231 : vector<2x128xf32>
    %233 = vector.extract_strided_slice %220 {offsets = [0, 256], sizes = [2, 128], strides = [1, 1]} : vector<2x512xf32> to vector<2x128xf32>
    %234 = math.tanh %233 : vector<2x128xf32>
    %235 = vector.extract_strided_slice %220 {offsets = [0, 384], sizes = [2, 128], strides = [1, 1]} : vector<2x512xf32> to vector<2x128xf32>
    %236 = arith.negf %235 : vector<2x128xf32>
    %237 = math.exp %236 : vector<2x128xf32>
    %cst_38 = arith.constant 1.000000e+00 : f32
    %238 = vector.broadcast %cst_38 : f32 to vector<2x128xf32>
    %239 = arith.addf %238, %237 : vector<2x128xf32>
    %240 = arith.divf %238, %239 : vector<2x128xf32>
    %241 = arith.mulf %232, %208 : vector<2x128xf32>
    %242 = arith.mulf %226, %234 : vector<2x128xf32>
    %243 = arith.addf %241, %242 : vector<2x128xf32>
    %244 = math.tanh %243 : vector<2x128xf32>
    %245 = arith.mulf %240, %244 : vector<2x128xf32>
    %246 = vector.extract_strided_slice %11 {offsets = [0, 1, 0], sizes = [2, 1, 512], strides = [1, 1, 1]} : vector<2x8x512xf32> to vector<2x1x512xf32>
    %247 = vector.shape_cast %246 : vector<2x1x512xf32> to vector<2x512xf32>
    %248 = vector.extract_strided_slice %11 {offsets = [0, 6, 0], sizes = [2, 1, 512], strides = [1, 1, 1]} : vector<2x8x512xf32> to vector<2x1x512xf32>
    %249 = vector.shape_cast %248 : vector<2x1x512xf32> to vector<2x512xf32>
    %250 = vector.shape_cast %30 : vector<1x512xi1> to vector<1x512xi1>
    %251 = vector.broadcast %250 : vector<1x512xi1> to vector<2x512xi1>
    %252 = arith.select %251, %247, %249 : vector<2x512xi1>, vector<2x512xf32>
    %253 = arith.truncf %245 : vector<2x128xf32> to vector<2x128xbf16>
    %cst_39 = arith.constant dense<0.000000e+00> : vector<2x512xf32>
    %254 = tpu.matmul %253, %3, %cst_39 {dimension_numbers = #tpu.dot_dimension_numbers<[1], [0], [0], [1], [0, 0, 1, 1], [], []>} : vector<2x128xbf16>, vector<128x512xbf16>, vector<2x512xf32> -> vector<2x512xf32>
    %255 = arith.addf %252, %254 : vector<2x512xf32>
    %256 = vector.extract_strided_slice %255 {offsets = [0, 0], sizes = [2, 128], strides = [1, 1]} : vector<2x512xf32> to vector<2x128xf32>
    %257 = arith.negf %256 : vector<2x128xf32>
    %258 = math.exp %257 : vector<2x128xf32>
    %cst_40 = arith.constant 1.000000e+00 : f32
    %259 = vector.broadcast %cst_40 : f32 to vector<2x128xf32>
    %260 = arith.addf %259, %258 : vector<2x128xf32>
    %261 = arith.divf %259, %260 : vector<2x128xf32>
    %262 = vector.extract_strided_slice %255 {offsets = [0, 128], sizes = [2, 128], strides = [1, 1]} : vector<2x512xf32> to vector<2x128xf32>
    %263 = arith.negf %262 : vector<2x128xf32>
    %264 = math.exp %263 : vector<2x128xf32>
    %cst_41 = arith.constant 1.000000e+00 : f32
    %265 = vector.broadcast %cst_41 : f32 to vector<2x128xf32>
    %266 = arith.addf %265, %264 : vector<2x128xf32>
    %267 = arith.divf %265, %266 : vector<2x128xf32>
    %268 = vector.extract_strided_slice %255 {offsets = [0, 256], sizes = [2, 128], strides = [1, 1]} : vector<2x512xf32> to vector<2x128xf32>
    %269 = math.tanh %268 : vector<2x128xf32>
    %270 = vector.extract_strided_slice %255 {offsets = [0, 384], sizes = [2, 128], strides = [1, 1]} : vector<2x512xf32> to vector<2x128xf32>
    %271 = arith.negf %270 : vector<2x128xf32>
    %272 = math.exp %271 : vector<2x128xf32>
    %cst_42 = arith.constant 1.000000e+00 : f32
    %273 = vector.broadcast %cst_42 : f32 to vector<2x128xf32>
    %274 = arith.addf %273, %272 : vector<2x128xf32>
    %275 = arith.divf %273, %274 : vector<2x128xf32>
    %276 = arith.mulf %267, %243 : vector<2x128xf32>
    %277 = arith.mulf %261, %269 : vector<2x128xf32>
    %278 = arith.addf %276, %277 : vector<2x128xf32>
    %279 = math.tanh %278 : vector<2x128xf32>
    %280 = arith.mulf %275, %279 : vector<2x128xf32>
    %281 = vector.extract_strided_slice %11 {offsets = [0, 0, 0], sizes = [2, 1, 512], strides = [1, 1, 1]} : vector<2x8x512xf32> to vector<2x1x512xf32>
    %282 = vector.shape_cast %281 : vector<2x1x512xf32> to vector<2x512xf32>
    %283 = vector.extract_strided_slice %11 {offsets = [0, 7, 0], sizes = [2, 1, 512], strides = [1, 1, 1]} : vector<2x8x512xf32> to vector<2x1x512xf32>
    %284 = vector.shape_cast %283 : vector<2x1x512xf32> to vector<2x512xf32>
    %285 = vector.shape_cast %30 : vector<1x512xi1> to vector<1x512xi1>
    %286 = vector.broadcast %285 : vector<1x512xi1> to vector<2x512xi1>
    %287 = arith.select %286, %282, %284 : vector<2x512xi1>, vector<2x512xf32>
    %288 = arith.truncf %280 : vector<2x128xf32> to vector<2x128xbf16>
    %cst_43 = arith.constant dense<0.000000e+00> : vector<2x512xf32>
    %289 = tpu.matmul %288, %3, %cst_43 {dimension_numbers = #tpu.dot_dimension_numbers<[1], [0], [0], [1], [0, 0, 1, 1], [], []>} : vector<2x128xbf16>, vector<128x512xbf16>, vector<2x512xf32> -> vector<2x512xf32>
    %290 = arith.addf %287, %289 : vector<2x512xf32>
    %291 = vector.extract_strided_slice %290 {offsets = [0, 0], sizes = [2, 128], strides = [1, 1]} : vector<2x512xf32> to vector<2x128xf32>
    %292 = arith.negf %291 : vector<2x128xf32>
    %293 = math.exp %292 : vector<2x128xf32>
    %cst_44 = arith.constant 1.000000e+00 : f32
    %294 = vector.broadcast %cst_44 : f32 to vector<2x128xf32>
    %295 = arith.addf %294, %293 : vector<2x128xf32>
    %296 = arith.divf %294, %295 : vector<2x128xf32>
    %297 = vector.extract_strided_slice %290 {offsets = [0, 128], sizes = [2, 128], strides = [1, 1]} : vector<2x512xf32> to vector<2x128xf32>
    %298 = arith.negf %297 : vector<2x128xf32>
    %299 = math.exp %298 : vector<2x128xf32>
    %cst_45 = arith.constant 1.000000e+00 : f32
    %300 = vector.broadcast %cst_45 : f32 to vector<2x128xf32>
    %301 = arith.addf %300, %299 : vector<2x128xf32>
    %302 = arith.divf %300, %301 : vector<2x128xf32>
    %303 = vector.extract_strided_slice %290 {offsets = [0, 256], sizes = [2, 128], strides = [1, 1]} : vector<2x512xf32> to vector<2x128xf32>
    %304 = math.tanh %303 : vector<2x128xf32>
    %305 = vector.extract_strided_slice %290 {offsets = [0, 384], sizes = [2, 128], strides = [1, 1]} : vector<2x512xf32> to vector<2x128xf32>
    %306 = arith.negf %305 : vector<2x128xf32>
    %307 = math.exp %306 : vector<2x128xf32>
    %cst_46 = arith.constant 1.000000e+00 : f32
    %308 = vector.broadcast %cst_46 : f32 to vector<2x128xf32>
    %309 = arith.addf %308, %307 : vector<2x128xf32>
    %310 = arith.divf %308, %309 : vector<2x128xf32>
    %311 = arith.mulf %302, %278 : vector<2x128xf32>
    %312 = arith.mulf %296, %304 : vector<2x128xf32>
    %313 = arith.addf %311, %312 : vector<2x128xf32>
    %314 = math.tanh %313 : vector<2x128xf32>
    %315 = arith.mulf %310, %314 : vector<2x128xf32>
    %316 = vector.shape_cast %33 : vector<1x128xi1> to vector<1x128xi1>
    %317 = vector.broadcast %316 : vector<1x128xi1> to vector<2x128xi1>
    %318 = arith.select %317, %315, %70 : vector<2x128xi1>, vector<2x128xf32>
    %319 = vector.shape_cast %33 : vector<1x128xi1> to vector<1x128xi1>
    %320 = vector.broadcast %319 : vector<1x128xi1> to vector<2x128xi1>
    %321 = arith.select %320, %280, %105 : vector<2x128xi1>, vector<2x128xf32>
    %322 = vector.shape_cast %33 : vector<1x128xi1> to vector<1x128xi1>
    %323 = vector.broadcast %322 : vector<1x128xi1> to vector<2x128xi1>
    %324 = arith.select %323, %245, %140 : vector<2x128xi1>, vector<2x128xf32>
    %325 = vector.shape_cast %33 : vector<1x128xi1> to vector<1x128xi1>
    %326 = vector.broadcast %325 : vector<1x128xi1> to vector<2x128xi1>
    %327 = arith.select %326, %210, %175 : vector<2x128xi1>, vector<2x128xf32>
    %328 = vector.shape_cast %33 : vector<1x128xi1> to vector<1x128xi1>
    %329 = vector.broadcast %328 : vector<1x128xi1> to vector<2x128xi1>
    %330 = arith.select %329, %175, %210 : vector<2x128xi1>, vector<2x128xf32>
    %331 = vector.shape_cast %33 : vector<1x128xi1> to vector<1x128xi1>
    %332 = vector.broadcast %331 : vector<1x128xi1> to vector<2x128xi1>
    %333 = arith.select %332, %140, %245 : vector<2x128xi1>, vector<2x128xf32>
    %334 = vector.shape_cast %33 : vector<1x128xi1> to vector<1x128xi1>
    %335 = vector.broadcast %334 : vector<1x128xi1> to vector<2x128xi1>
    %336 = arith.select %335, %105, %280 : vector<2x128xi1>, vector<2x128xf32>
    %337 = vector.shape_cast %33 : vector<1x128xi1> to vector<1x128xi1>
    %338 = vector.broadcast %337 : vector<1x128xi1> to vector<2x128xi1>
    %339 = arith.select %338, %70, %315 : vector<2x128xi1>, vector<2x128xf32>
    %340 = vector.shape_cast %318 : vector<2x128xf32> to vector<2x1x128xf32>
    %341 = vector.shape_cast %321 : vector<2x128xf32> to vector<2x1x128xf32>
    %342 = vector.shape_cast %324 : vector<2x128xf32> to vector<2x1x128xf32>
    %343 = vector.shape_cast %327 : vector<2x128xf32> to vector<2x1x128xf32>
    %344 = vector.shape_cast %330 : vector<2x128xf32> to vector<2x1x128xf32>
    %345 = vector.shape_cast %333 : vector<2x128xf32> to vector<2x1x128xf32>
    %346 = vector.shape_cast %336 : vector<2x128xf32> to vector<2x1x128xf32>
    %347 = vector.shape_cast %339 : vector<2x128xf32> to vector<2x1x128xf32>
    %348 = tpu.concatenate %340, %341, %342, %343, %344, %345, %346, %347 in 1 : vector<2x1x128xf32>, vector<2x1x128xf32>, vector<2x1x128xf32>, vector<2x1x128xf32>, vector<2x1x128xf32>, vector<2x1x128xf32>, vector<2x1x128xf32>, vector<2x1x128xf32> -> vector<2x8x128xf32>
    %349 = vector.broadcast %5 : f32 to vector<2x8x128xf32>
    %350 = arith.mulf %349, %0 : vector<2x8x128xf32>
    %351 = vector.broadcast %6 : f32 to vector<2x8x128xf32>
    %352 = arith.mulf %351, %348 : vector<2x8x128xf32>
    %353 = arith.addf %350, %352 : vector<2x8x128xf32>
    %c0_47 = arith.constant 0 : index
    %c0_48 = arith.constant 0 : index
    %c0_49 = arith.constant 0 : index
    %354 = vector.load %arg6[%c0_47, %c0_48, %c0_49] : memref<2x8x128xf32, #tpu.memory_space<vmem>>, vector<2x8x128xf32>
    tpu.vector_store %arg6[%c0_47, %c0_48, %c0_49], %353 {strides = array<i32>} : memref<2x8x128xf32, #tpu.memory_space<vmem>>, vector<2x8x128xf32>,
    return
  }
  func.func @transform_0(%arg0: i32) -> (i32, i32, i32) {
    %c0_i32 = arith.constant 0 : i32
    %c0_i32_0 = arith.constant 0 : i32
    %c0_i32_1 = arith.constant 0 : i32
    return %arg0, %c0_i32, %c0_i32_0 : i32, i32, i32
  }
  func.func @transform_1(%arg0: i32) -> (i32, i32) {
    %c0_i32 = arith.constant 0 : i32
    %c0_i32_0 = arith.constant 0 : i32
    %c0_i32_1 = arith.constant 0 : i32
    return %c0_i32, %c0_i32_0 : i32, i32
  }
  func.func @transform_2(%arg0: i32) -> (i32, i32) {
    %c0_i32 = arith.constant 0 : i32
    %c0_i32_0 = arith.constant 0 : i32
    %c0_i32_1 = arith.constant 0 : i32
    return %c0_i32, %c0_i32_0 : i32, i32
  }
  func.func @transform_3(%arg0: i32) -> (i32, i32) {
    %c0_i32 = arith.constant 0 : i32
    %c0_i32_0 = arith.constant 0 : i32
    %c0_i32_1 = arith.constant 0 : i32
    return %c0_i32, %c0_i32_0 : i32, i32
  }
  func.func @transform_4(%arg0: i32) -> i32 {
    %c0_i32 = arith.constant 0 : i32
    %c0_i32_0 = arith.constant 0 : i32
    return %c0_i32 : i32
  }
  func.func @transform_5(%arg0: i32) -> (i32, i32, i32) {
    %c0_i32 = arith.constant 0 : i32
    %c0_i32_0 = arith.constant 0 : i32
    %c0_i32_1 = arith.constant 0 : i32
    return %arg0, %c0_i32, %c0_i32_0 : i32, i32, i32
  }
}

</mosaic_0001>

<bundles_post_ra>
// kernel: tpu_custom_call.1
= control target key start
LH: loop header
LB: loop body
LE: loop exit
PB: predicated region body
PF: predicated region fallthrough
CT: control target
= control target key end

     0   :  { %10 = vsyncpa [#allocation3], 0  ;;  %s3526_s0 = inlined_call_operand.hbm [shape: f32[2,8,128], index: 0, kind: input, shape index: {}]   ;;  %s3527_s1 = inlined_call_operand.hbm [shape: bf16[128,512], index: 1, kind: input, shape index: {}]   ;;  %s3528_s2 = inlined_call_operand.hbm [shape: bf16[128,512], index: 2, kind: input, shape index: {}]   ;;  %s3529_s3 = inlined_call_operand.vmem [shape: f32[1,512], index: 3, kind: input, shape index: {}]   ;;  %s3530_s4 = inlined_call_operand.vmem [shape: f32[2], index: 4, kind: input, shape index: {}]   ;;  %s3531_s5 = inlined_call_operand.hbm [shape: f32[2,8,128], index: 5, kind: output, shape index: {}]  }
   0x1   :  { %11 = vsyncpa [#allocation7], 0 }
   0x2   :  { %12 = vsyncpa [#allocation5], 0 }
   0x3   :  { %13 = vsyncpa [#allocation4], 0  ;;  %s2470_s18 = smov [#allocation6]  }
   0x4   :  { %s31_s19 = sshll.u32 %s2470_s18, 4  ;;  %s32_s19 = int_to_ptr.vmem [resolvable:$true] %s31_s19 }
   0x5   :  { %s2378_s20 = scalar_lea.vmem %s32_s19, 4096  ;;  %p2383_p1 = scmp.lt.s32.totalorder %s32_s19, %s32_s19 }
   0x6   :  { %p2379_p0 = scmp.ne.s32.totalorder %s32_s19, %s2378_s20  ;;  %p2384_p2 = scmp.lt.s32.totalorder %s2378_s20, %s2378_s20 }
   0x8   :  { %p2385_p3 = por %p2384_p2, %p2383_p1 }
   0xa   :  { %p2386_p4 = pnand %p2385_p3, %p2379_p0 }
   0xc   :  { %2389 = shalt.err (!%p2386_p4)
}
   0xd   :  { %s2471_s21 = smov 256   ;;  %s2472_s22 = smov 16  }
   0xe   :  { %37 = dma.hbm_to_vmem [thread:$0]  %s3527_s1, 4096, %s32_s19, [#allocation7], %s2471_s21, %s2471_s21, %s2472_s22  }
   0xf   :  { %s2473_s25 = smov [#allocation2]  }
  0x10   :  { %s19_s26 = sshll.u32 %s2473_s25, 4  ;;  %s20_s26 = int_to_ptr.vmem [resolvable:$true] %s19_s26 }
  0x11   :  { %s2398_s27 = scalar_lea.vmem %s20_s26, 256  ;;  %p2403_p6 = scmp.lt.s32.totalorder %s20_s26, %s20_s26 }
  0x12   :  { %p2399_p5 = scmp.ne.s32.totalorder %s20_s26, %s2398_s27  ;;  %p2404_p7 = scmp.lt.s32.totalorder %s2398_s27, %s2398_s27 }
  0x14   :  { %p2405_p8 = por %p2404_p7, %p2403_p6 }
  0x16   :  { %p2406_p9 = pnand %p2405_p8, %p2399_p5 }
  0x18   :  { %2409 = shalt.err (!%p2406_p9)
}
  0x19   :  { %s2474_s28 = smov 128   ;;  %s2475_s29 = smov 8  }
  0x1a   :  { %25 = dma.hbm_to_vmem [thread:$0]  %s3526_s0, 256, %s20_s26, [#allocation3], %s2474_s28, %s2474_s28, %s2475_s29  }
  0x1b   :  { %s58_s8 = sshll.u32 %s3530_s4, 4  ;;  %s2476_s9 = smov [#allocation8]   ;;  %s59_s8 = int_to_ptr.vmem [resolvable:$true] %s58_s8 }
  0x1c   :  { %s43_s10 = sshll.u32 %s2476_s9, 4  ;;  %s44_s10 = int_to_ptr.vmem [resolvable:$true] %s43_s10 }
  0x1d   :  { %s2418_s11 = scalar_lea.vmem %s44_s10, 4096  ;;  %p2423_p11 = scmp.lt.s32.totalorder %s44_s10, %s44_s10 }
  0x1e   :  { %p2419_p10 = scmp.ne.s32.totalorder %s44_s10, %s2418_s11  ;;  %p2424_p12 = scmp.lt.s32.totalorder %s2418_s11, %s2418_s11 }
  0x20   :  { %p2425_p13 = por %p2424_p12, %p2423_p11 }
  0x22   :  { %p2426_p0 = pnand %p2425_p13, %p2419_p10 }
  0x24   :  { %2429 = shalt.err (!%p2426_p0)
}
  0x25   :  { %49 = dma.hbm_to_vmem [thread:$0]  %s3528_s2, 4096, %s44_s10, [#allocation7], %s2471_s21, %s2471_s21, %s2472_s22  }
  0x26   :  { %s2430_s13 = scalar_lea.vmem %s59_s8, 16  ;;  %p2435_p2 = scmp.lt.s32.totalorder %s59_s8, %s59_s8 }
  0x27   :  { %p2431_p1 = scmp.ne.s32.totalorder %s59_s8, %s2430_s13  ;;  %p2436_p3 = scmp.lt.s32.totalorder %s2430_s13, %s2430_s13 }
  0x29   :  { %p2437_p4 = por %p2436_p3, %p2435_p2 }
  0x2b   :  { %p2438_p5 = pnand %p2437_p4, %p2431_p1 }
  0x2d   :  { %2441 = shalt.err (!%p2438_p5)
}
  0x2e   :  { %s2477_s4 = smov [#allocation9]  }
  0x2f   :  { %61 = dma.vmem_to_smem %s59_s8, 16, %s2477_s4, [#allocation5]  }
  0x30   :  { %2462 = dma.done.wait [#allocation3], 256  }
  0x31   :  { %2463 = vsyncadd [#allocation3], 4294967040 }
  0x32   :  { %2464 = dma.done.wait [#allocation7], 8192  }
  0x33   :  { %2465 = vsyncadd [#allocation7], 4294959104 }
  0x34   :  { %2466 = dma.done.wait [#allocation5], 16  }
  0x35   :  { %2467 = vsyncadd [#allocation5], 4294967280 }
  0x36   :  { %74 = sfence }
  0x37   :  { %v2112_v0 = vld [vmem:[#allocation6 + $0xe4] ss:$16 sps:$4 sm:$0xff]   ;;  %v2114_v1 = vld [vmem:[#allocation6 + $0xec] ss:$16 sps:$4 sm:$0xff]   ;;  %v3532_v2 = vmov 0   ;;  %vm496_vm1 = vcmask 1041409  }
  0x38   :  { %366 = vmatprep.mubr.bf16.mxu0 %v3532_v2  ;;  %409 = vmatprep.mubr.bf16.mxu1 %v3532_v2  ;;  %v2116_v3 = vld [vmem:[#allocation6 + $0xe0] ss:$16 sps:$4 sm:$0xff]   ;;  %v2117_v4 = vld [vmem:[#allocation6 + $0xe8] ss:$16 sps:$4 sm:$0xff]   ;;  %v2118_v5 = vld [vmem:[#allocation6 + $0xc4] ss:$16 sps:$4 sm:$0xff]  }
  0x39   :  { %334 = vmatprep.subr.bf16.mxu0 %v2112_v0  ;;  %377 = vmatprep.subr.bf16.mxu1 %v2114_v1  ;;  %v2120_v6 = vld [vmem:[#allocation6 + $0xcc] ss:$16 sps:$4 sm:$0xff]   ;;  %v2122_v7 = vld [vmem:[#allocation6 + $0xc0] ss:$16 sps:$4 sm:$0xff]   ;;  %v2123_v8 = vld [vmem:[#allocation6 + $0xc8] ss:$16 sps:$4 sm:$0xff]  }
  0x3a   :  { %335 = vmatpush1.bf16.msra.mxu0 %v2116_v3  ;;  %378 = vmatpush1.bf16.msra.mxu1 %v2117_v4  ;;  %v2124_v9 = vld [vmem:[#allocation6 + $0xa4] ss:$16 sps:$4 sm:$0xff]   ;;  %v2126_v10 = vld [vmem:[#allocation6 + $0xac] ss:$16 sps:$4 sm:$0xff]   ;;  %v2128_v11 = vld [vmem:[#allocation6 + $0xa0] ss:$16 sps:$4 sm:$0xff]  }
  0x3b   :  { %336 = vmatprep.subr.bf16.mxu0 %v2118_v5  ;;  %379 = vmatprep.subr.bf16.mxu1 %v2120_v6  ;;  %v2129_v12 = vld [vmem:[#allocation6 + $0xa8] ss:$16 sps:$4 sm:$0xff]   ;;  %v2130_v13 = vld [vmem:[#allocation6 + $0x84] ss:$16 sps:$4 sm:$0xff]   ;;  %v2132_v14 = vld [vmem:[#allocation6 + $0x8c] ss:$16 sps:$4 sm:$0xff]   ;;  %v148_v5 = vlaneseq }
  0x3c   :  { %v2134_v15 = vld [vmem:[#allocation6 + $0x80] ss:$16 sps:$4 sm:$0xff]   ;;  %v2135_v16 = vld [vmem:[#allocation6 + $0x88] ss:$16 sps:$4 sm:$0xff]   ;;  %v2136_v17 = vld [vmem:[#allocation6 + $0x64] ss:$16 sps:$4 sm:$0xff]  }
  0x3d   :  { %v2138_v18 = vld [vmem:[#allocation6 + $0x6c] ss:$16 sps:$4 sm:$0xff]   ;;  %v2140_v19 = vld [vmem:[#allocation6 + $0x60] ss:$16 sps:$4 sm:$0xff]   ;;  %v2141_v20 = vld [vmem:[#allocation6 + $0x68] ss:$16 sps:$4 sm:$0xff]  }
  0x3e   :  { %337 = vmatpush1.bf16.msra.mxu0 %v2122_v7  ;;  %380 = vmatpush1.bf16.msra.mxu1 %v2123_v8  ;;  %v2142_v21 = vld [vmem:[#allocation6 + $0x44] ss:$16 sps:$4 sm:$0xff]   ;;  %v2144_v22 = vld [vmem:[#allocation6 + $0x4c] ss:$16 sps:$4 sm:$0xff]   ;;  %v2146_v23 = vld [vmem:[#allocation6 + $0x40] ss:$16 sps:$4 sm:$0xff]  }
  0x3f   :  { %338 = vmatprep.subr.bf16.mxu0 %v2124_v9  ;;  %381 = vmatprep.subr.bf16.mxu1 %v2126_v10  ;;  %v2147_v24 = vld [vmem:[#allocation6 + $0x48] ss:$16 sps:$4 sm:$0xff]   ;;  %v2148_v25 = vld [vmem:[#allocation6 + $0x24] ss:$16 sps:$4 sm:$0xff]   ;;  %v2150_v26 = vld [vmem:[#allocation6 + $0x2c] ss:$16 sps:$4 sm:$0xff]  }
  0x40   :  { %v2152_v27 = vld [vmem:[#allocation6 + $0x20] ss:$16 sps:$4 sm:$0xff]   ;;  %v2153_v28 = vld [vmem:[#allocation6 + $0x28] ss:$16 sps:$4 sm:$0xff]   ;;  %v2154_v29 = vld [vmem:[#allocation6 + $0x4] ss:$16 sps:$4 sm:$0xff]  }
  0x41   :  { %v2156_v30 = vld [vmem:[#allocation6 + $0xc] ss:$16 sps:$4 sm:$0xff]   ;;  %v2158_v31 = vld [vmem:[#allocation6] ss:$16 sps:$4 sm:$0xff]   ;;  %v2159_v32 = vld [vmem:[#allocation6 + $0x8] ss:$16 sps:$4 sm:$0xff]  }
  0x42   :  { %339 = vmatpush1.bf16.msra.mxu0 %v2128_v11  ;;  %382 = vmatpush1.bf16.msra.mxu1 %v2129_v12  ;;  %v76_v33 = vld [vmem:[#allocation2] sm:$0xff]  ;;  %v77_v34 = vld [vmem:[#allocation2 + $0x8] sm:$0xff]  ;;  %v2670_v6 = vshrl.u32 %v148_v5, 7  ;;  %v2676_v9 = vand.u32 127, %v148_v5  ;;  %s3484_s15 = sld [smem:[#allocation9 + $0x1]]  ;;  %vm1960_vm5 = vcmask 1040384  }
  0x43   :  { %340 = vmatprep.subr.bf16.mxu0 %v2130_v13  ;;  %383 = vmatprep.subr.bf16.mxu1 %v2132_v14  ;;  %v2534_v35 = vld [vmem:[#allocation8 + $0xe4] ss:$16 sps:$4 sm:$0xff]   ;;  %v2536_v36 = vld [vmem:[#allocation8 + $0xec] ss:$16 sps:$4 sm:$0xff]   ;;  %v2100_v37 = vpack.c.bf16 %v77_v34, %v76_v33  ;;  %v2538_v38 = vld [vmem:[#allocation8 + $0xe0] ss:$16 sps:$4 sm:$0xff]  }
  0x44   :  { %3598 = vst [vmem:[#allocation15_spill] sm:$0xff] %v2534_v35  ;;  %3599 = vst [vmem:[#allocation16_spill] sm:$0xff] %v2536_v36  ;;  %v2540_v39 = vld [vmem:[#allocation8 + $0xe8] ss:$16 sps:$4 sm:$0xff]   ;;  %v2542_v40 = vld [vmem:[#allocation8 + $0xc4] ss:$16 sps:$4 sm:$0xff]  }
  0x45   :  { %v2546_v41 = vld [vmem:[#allocation8 + $0xcc] ss:$16 sps:$4 sm:$0xff]   ;;  %v2548_v42 = vld [vmem:[#allocation8 + $0xc0] ss:$16 sps:$4 sm:$0xff]   ;;  %v2552_v43 = vld [vmem:[#allocation8 + $0xc8] ss:$16 sps:$4 sm:$0xff]  }
  0x46   :  { %341 = vmatpush1.bf16.msra.mxu0 %v2134_v15  ;;  %384 = vmatpush1.bf16.msra.mxu1 %v2135_v16  ;;  %v2556_v44 = vld [vmem:[#allocation8 + $0xa4] ss:$16 sps:$4 sm:$0xff]   ;;  %v2558_v45 = vld [vmem:[#allocation8 + $0xac] ss:$16 sps:$4 sm:$0xff]   ;;  %v2562_v46 = vld [vmem:[#allocation8 + $0xa0] ss:$16 sps:$4 sm:$0xff]  }
  0x47   :  { %342 = vmatprep.subr.bf16.mxu0 %v2136_v17  ;;  %385 = vmatprep.subr.bf16.mxu1 %v2138_v18  ;;  %v2566_v47 = vld [vmem:[#allocation8 + $0xa8] ss:$16 sps:$4 sm:$0xff]   ;;  %v2568_v48 = vld [vmem:[#allocation8 + $0x84] ss:$16 sps:$4 sm:$0xff]   ;;  %v2572_v49 = vld [vmem:[#allocation8 + $0x8c] ss:$16 sps:$4 sm:$0xff]  }
  0x48   :  { %v2576_v50 = vld [vmem:[#allocation8 + $0x80] ss:$16 sps:$4 sm:$0xff]   ;;  %v2578_v51 = vld [vmem:[#allocation8 + $0x88] ss:$16 sps:$4 sm:$0xff]   ;;  %v2582_v52 = vld [vmem:[#allocation8 + $0x64] ss:$16 sps:$4 sm:$0xff]  }
  0x49   :  { %v2584_v53 = vld [vmem:[#allocation8 + $0x6c] ss:$16 sps:$4 sm:$0xff]   ;;  %v2588_v54 = vld [vmem:[#allocation8 + $0x60] ss:$16 sps:$4 sm:$0xff]   ;;  %v2590_v55 = vld [vmem:[#allocation8 + $0x68] ss:$16 sps:$4 sm:$0xff]  }
  0x4a   :  { %343 = vmatpush1.bf16.msra.mxu0 %v2140_v19  ;;  %386 = vmatpush1.bf16.msra.mxu1 %v2141_v20  ;;  %3600 = vst [vmem:[#allocation17_spill] sm:$0xff] %v2584_v53  ;;  %3601 = vst [vmem:[#allocation18_spill] sm:$0xff] %v2588_v54  ;;  %v2594_v56 = vld [vmem:[#allocation8 + $0x44] ss:$16 sps:$4 sm:$0xff]   ;;  %v2596_v57 = vld [vmem:[#allocation8 + $0x4c] ss:$16 sps:$4 sm:$0xff]  }
  0x4b   :  { %344 = vmatprep.subr.bf16.mxu0 %v2142_v21  ;;  %387 = vmatprep.subr.bf16.mxu1 %v2144_v22  ;;  %3602 = vst [vmem:[#allocation19_spill] sm:$0xff] %v2590_v55  ;;  %3603 = vst [vmem:[#allocation20_spill] sm:$0xff] %v2594_v56  ;;  %v2600_v58 = vld [vmem:[#allocation8 + $0x40] ss:$16 sps:$4 sm:$0xff]   ;;  %v2602_v59 = vld [vmem:[#allocation8 + $0x48] ss:$16 sps:$4 sm:$0xff]  }
  0x4c   :  { %3604 = vst [vmem:[#allocation21_spill] sm:$0xff] %v2596_v57  ;;  %3605 = vst [vmem:[#allocation22_spill] sm:$0xff] %v2600_v58  ;;  %v2606_v60 = vld [vmem:[#allocation8 + $0x24] ss:$16 sps:$4 sm:$0xff]   ;;  %v2608_v61 = vld [vmem:[#allocation8 + $0x2c] ss:$16 sps:$4 sm:$0xff]  }
  0x4d   :  { %3606 = vst [vmem:[#allocation23_spill] sm:$0xff] %v2602_v59  ;;  %3607 = vst [vmem:[#allocation24_spill] sm:$0xff] %v2606_v60  ;;  %v2612_v62 = vld [vmem:[#allocation8 + $0x20] ss:$16 sps:$4 sm:$0xff]   ;;  %v2614_v63 = vld [vmem:[#allocation8 + $0x28] ss:$16 sps:$4 sm:$0xff]  }
  0x4e   :  { %345 = vmatpush1.bf16.msra.mxu0 %v2146_v23  ;;  %388 = vmatpush1.bf16.msra.mxu1 %v2147_v24  ;;  %3608 = vst [vmem:[#allocation25_spill] sm:$0xff] %v2608_v61  ;;  %3609 = vst [vmem:[#allocation26_spill] sm:$0xff] %v2612_v62  ;;  %v2618_v0 = vld [vmem:[#allocation8 + $0x4] ss:$16 sps:$4 sm:$0xff]   ;;  %v2620_v1 = vld [vmem:[#allocation8 + $0xc] ss:$16 sps:$4 sm:$0xff]  }
  0x4f   :  { %346 = vmatprep.subr.bf16.mxu0 %v2148_v25  ;;  %389 = vmatprep.subr.bf16.mxu1 %v2150_v26  ;;  %3610 = vst [vmem:[#allocation27_spill] sm:$0xff] %v2614_v63  ;;  %3611 = vst [vmem:[#allocation28_spill] sm:$0xff] %v2618_v0  ;;  %v2624_v3 = vld [vmem:[#allocation8] ss:$16 sps:$4 sm:$0xff]   ;;  %v2626_v4 = vld [vmem:[#allocation8 + $0x8] ss:$16 sps:$4 sm:$0xff]  }
  0x50   :  { %3612 = vst [vmem:[#allocation29_spill] sm:$0xff] %v2620_v1  ;;  %3613 = vst [vmem:[#allocation30_spill] sm:$0xff] %v2624_v3  ;;  %v2673_v7 = vsub.s32 0, %v2670_v6  ;;  %v158_v8 = vsub.s32 2, %v2670_v6  ;;  %v144_v10 = vld [vmem:[%s3529_s3] sm:$0xf] }
  0x51   :  { %3614 = vst [vmem:[#allocation31_spill] sm:$0xff] %v2626_v4  ;;  %3615 = vst [vmem:[#allocation32_spill] sm:$0xff] %v2670_v6  ;;  %v154_v11 = vsub.s32 1, %v2670_v6  ;;  %v162_v12 = vsub.s32 3, %v2670_v6  ;;  %v423_v13 = vadd.s32 256, %v2676_v9  ;;  %v422_v16 = vadd.s32 128, %v2676_v9 }
  0x52   :  { %347 = vmatpush1.bf16.msra.mxu0 %v2152_v27  ;;  %390 = vmatpush1.bf16.msra.mxu1 %v2153_v28  ;;  %3616 = vst [vmem:[#allocation33_spill] sm:$0xff] %v2673_v7  ;;  %3617 = vst [vmem:[#allocation34_spill] sm:$0xff] %v2676_v9  ;;  %v151_v14 = vrot.slane %v144_v10, %v2673_v7  ;;  %v159_v15 = vrot.slane %v144_v10, %v158_v8  ;;  %v424_v17 = vadd.s32 384, %v2676_v9  ;;  %s3470_s3 = sld [smem:[#allocation9]]  ;;  %vm1963_vm6 = vcmask 1041408   ;;  %s2480_s16 = smov [#allocation10]  }
  0x53   :  { %348 = vmatprep.subr.bf16.mxu0 %v2154_v29  ;;  %391 = vmatprep.subr.bf16.mxu1 %v2156_v30  ;;  %v155_v18 = vrot.slane %v144_v10, %v154_v11  ;;  %v163_v19 = vrot.slane %v144_v10, %v162_v12  ;;  %v443_v22 = vand.u32 127, %v423_v13  ;;  %v436_v25 = vand.u32 127, %v422_v16  ;;  %s1996_s17 = sshll.u32 %s2480_s16, 4  ;;  %s1997_s17 = int_to_ptr.vmem [resolvable:$true] %s1996_s17 }
  0x54   :  { %v450_v28 = vand.u32 127, %v424_v17  ;;  %vm473_vm0 = vcmp.ge.s32.totalorder %v2676_v9, 64  ;;  %vm1966_vm7 = vcmask 1042432   ;;  %vm1969_vm8 = vcmask 1043456   ;;  %s2442_s18 = scalar_lea.vmem %s1997_s17, 256  ;;  %p2447_p7 = scmp.lt.s32.totalorder %s1997_s17, %s1997_s17 }
  0x55   :  { %vm2697_vm2 = vcmp.ge.s32.totalorder %v443_v22, 64  ;;  %vm2707_vm3 = vcmp.ge.s32.totalorder %v436_v25, 64  ;;  %vm1972_vm9 = vcmask 1044480   ;;  %vm1975_vm10 = vcmask 1045504   ;;  %p2443_p6 = scmp.ne.s32.totalorder %s1997_s17, %s2442_s18  ;;  %p2448_p8 = scmp.lt.s32.totalorder %s2442_s18, %s2442_s18 }
  0x56   :  { %349 = vmatpush1.bf16.msra.mxu0 %v2158_v31  ;;  %392 = vmatpush1.bf16.msra.mxu1 %v2159_v32  ;;  %vm2714_vm4 = vcmp.ge.s32.totalorder %v450_v28, 64  ;;  %vm1978_vm11 = vcmask 1046528  }
  0x57   :  { %687 = vmatprep.subr.bf16.mxu0 %v2534_v35  ;;  %728 = vmatprep.subr.bf16.mxu1 %v2536_v36  ;;  %p2449_p9 = por %p2448_p8, %p2447_p7 }
  0x58   :  { %v3661_v9 = vld [vmem:[#allocation31_spill] sm:$0xff] }
  0x59   :  { %367 = vmatmul.mubr.bf16.vlgmr.msra.gmra.mxu0 %v2100_v37  ;;  %410 = vmatmul.mubr.bf16.vlgmr.msra.gmra.mxu1 %v2100_v37  ;;  %p2450_p10 = pnand %p2449_p9, %p2443_p6 }
  0x5a   :  { %688 = vmatpush1.bf16.msra.mxu0 %v2538_v38  ;;  %729 = vmatpush1.bf16.msra.mxu1 %v2540_v39 }
  0x5b   :  { %689 = vmatprep.subr.bf16.mxu0 %v2542_v40  ;;  %730 = vmatprep.subr.bf16.mxu1 %v2546_v41 }
  0x5c   :  { %719 = vmatprep.mubr.bf16.mxu0 %v3532_v2  ;;  %760 = vmatprep.mubr.bf16.mxu1 %v3532_v2 }
  0x5e   :  { %690 = vmatpush1.bf16.msra.mxu0 %v2548_v42  ;;  %731 = vmatpush1.bf16.msra.mxu1 %v2552_v43 }
  0x5f   :  { %691 = vmatprep.subr.bf16.mxu0 %v2556_v44  ;;  %732 = vmatprep.subr.bf16.mxu1 %v2558_v45 }
  0x62   :  { %692 = vmatpush1.bf16.msra.mxu0 %v2562_v46  ;;  %733 = vmatpush1.bf16.msra.mxu1 %v2566_v47 }
  0x63   :  { %693 = vmatprep.subr.bf16.mxu0 %v2568_v48  ;;  %734 = vmatprep.subr.bf16.mxu1 %v2572_v49 }
  0x66   :  { %694 = vmatpush1.bf16.msra.mxu0 %v2576_v50  ;;  %735 = vmatpush1.bf16.msra.mxu1 %v2578_v51 }
  0x67   :  { %695 = vmatprep.subr.bf16.mxu0 %v2582_v52  ;;  %736 = vmatprep.subr.bf16.mxu1 %v2584_v53 }
  0x6a   :  { %696 = vmatpush1.bf16.msra.mxu0 %v2588_v54  ;;  %737 = vmatpush1.bf16.msra.mxu1 %v2590_v55 }
  0x6b   :  { %697 = vmatprep.subr.bf16.mxu0 %v2594_v56  ;;  %738 = vmatprep.subr.bf16.mxu1 %v2596_v57 }
  0x6e   :  { %698 = vmatpush1.bf16.msra.mxu0 %v2600_v58  ;;  %739 = vmatpush1.bf16.msra.mxu1 %v2602_v59 }
  0x6f   :  { %699 = vmatprep.subr.bf16.mxu0 %v2606_v60  ;;  %740 = vmatprep.subr.bf16.mxu1 %v2608_v61 }
  0x72   :  { %700 = vmatpush1.bf16.msra.mxu0 %v2612_v62  ;;  %741 = vmatpush1.bf16.msra.mxu1 %v2614_v63 }
  0x73   :  { %701 = vmatprep.subr.bf16.mxu0 %v2618_v0  ;;  %742 = vmatprep.subr.bf16.mxu1 %v2620_v1 }
  0x76   :  { %702 = vmatpush1.bf16.msra.mxu0 %v2624_v3  ;;  %743 = vmatpush1.bf16.msra.mxu1 %v2626_v4 }
  0x77   :  { %830 = vmatprep.subr.bf16.mxu0 %v2534_v35  ;;  %871 = vmatprep.subr.bf16.mxu1 %v2536_v36 }
  0x79   :  { %720 = vmatmul.mubr.bf16.vlgmr.msra.gmra.mxu0 %v3532_v2  ;;  %761 = vmatmul.mubr.bf16.vlgmr.msra.gmra.mxu1 %v3532_v2 }
  0x7a   :  { %831 = vmatpush1.bf16.msra.mxu0 %v2538_v38  ;;  %872 = vmatpush1.bf16.msra.mxu1 %v2540_v39 }
  0x7b   :  { %832 = vmatprep.subr.bf16.mxu0 %v2542_v40  ;;  %873 = vmatprep.subr.bf16.mxu1 %v2546_v41 }
  0x7c   :  { %862 = vmatprep.mubr.bf16.mxu0 %v3532_v2  ;;  %903 = vmatprep.mubr.bf16.mxu1 %v3532_v2 }
  0x7e   :  { %833 = vmatpush1.bf16.msra.mxu0 %v2548_v42  ;;  %874 = vmatpush1.bf16.msra.mxu1 %v2552_v43 }
  0x7f   :  { %834 = vmatprep.subr.bf16.mxu0 %v2556_v44  ;;  %875 = vmatprep.subr.bf16.mxu1 %v2558_v45 }
  0x82   :  { %835 = vmatpush1.bf16.msra.mxu0 %v2562_v46  ;;  %876 = vmatpush1.bf16.msra.mxu1 %v2566_v47 }
  0x83   :  { %836 = vmatprep.subr.bf16.mxu0 %v2568_v48  ;;  %877 = vmatprep.subr.bf16.mxu1 %v2572_v49 }
  0x86   :  { %837 = vmatpush1.bf16.msra.mxu0 %v2576_v50  ;;  %878 = vmatpush1.bf16.msra.mxu1 %v2578_v51 }
  0x87   :  { %838 = vmatprep.subr.bf16.mxu0 %v2582_v52  ;;  %879 = vmatprep.subr.bf16.mxu1 %v2584_v53 }
  0x8a   :  { %839 = vmatpush1.bf16.msra.mxu0 %v2588_v54  ;;  %880 = vmatpush1.bf16.msra.mxu1 %v2590_v55 }
  0x8b   :  { %840 = vmatprep.subr.bf16.mxu0 %v2594_v56  ;;  %881 = vmatprep.subr.bf16.mxu1 %v2596_v57 }
  0x8e   :  { %841 = vmatpush1.bf16.msra.mxu0 %v2600_v58  ;;  %882 = vmatpush1.bf16.msra.mxu1 %v2602_v59 }
  0x8f   :  { %842 = vmatprep.subr.bf16.mxu0 %v2606_v60  ;;  %883 = vmatprep.subr.bf16.mxu1 %v2608_v61 }
  0x92   :  { %843 = vmatpush1.bf16.msra.mxu0 %v2612_v62  ;;  %884 = vmatpush1.bf16.msra.mxu1 %v2614_v63 }
  0x93   :  { %844 = vmatprep.subr.bf16.mxu0 %v2618_v0  ;;  %885 = vmatprep.subr.bf16.mxu1 %v2620_v1 }
  0x96   :  { %845 = vmatpush1.bf16.msra.mxu0 %v2624_v3  ;;  %886 = vmatpush1.bf16.msra.mxu1 %v2626_v4 }
  0x97   :  { %977 = vmatprep.subr.bf16.mxu0 %v2534_v35  ;;  %1018 = vmatprep.subr.bf16.mxu1 %v2536_v36 }
 0x119   :  { %v368_v20 = vpop.f32.mrf.mxu0  ;;  %v411_v21 = vpop.f32.mrf.mxu1 }
 0x11a   :  { %v2687_v23 = vadd.f32 %v368_v20, %v151_v14  ;;  %v2689_v24 = vadd.f32 %v411_v21, %v159_v15 }
 0x11b   :  { %v370_v26 = vpop.f32.mrf.mxu0  ;;  %v413_v27 = vpop.f32.mrf.mxu1 }
 0x11c   :  { %v2691_v29 = vadd.f32 %v370_v26, %v155_v18  ;;  %v2693_v30 = vadd.f32 %v413_v27, %v163_v19  ;;  %v494_v33 = vrot.slane %v2687_v23, 7  ;;  %v501_v37 = vrot.slane %v2689_v24, 7 }
 0x11d   :  { %v372_v31 = vpop.f32.mrf.mxu0  ;;  %v415_v32 = vpop.f32.mrf.mxu1  ;;  %v813_v5 = vrot.slane %v2687_v23, 1  ;;  %v797_v12 = vrot.slane %v2687_v23, 6  ;;  %v803_v13 = vrot.slane %v2689_v24, 6  ;;  %v1093_v54 = vrot.slane %v2689_v24, 4 }
 0x11e   :  { %v2703_v8 = vadd.f32 %v372_v31, %v151_v14  ;;  %v2705_v10 = vadd.f32 %v415_v32, %v159_v15  ;;  %v498_v20 = vrot.slane %v2691_v29, 7  ;;  %v504_v14 = vrot.slane %v2693_v30, 7 }
 0x11f   :  { %v374_v16 = vpop.f32.mrf.mxu0  ;;  %v417_v17 = vpop.f32.mrf.mxu1  ;;  %v817_v15 = vrot.slane %v2689_v24, 1  ;;  %v800_v22 = vrot.slane %v2691_v29, 6  ;;  %v815_v36 = vrot.slane %v2691_v29, 1  ;;  %v806_v35 = vrot.slane %v2693_v30, 6 }
 0x120   :  { %v2721_v25 = vadd.f32 %v374_v16, %v155_v18  ;;  %v2723_v26 = vadd.f32 %v417_v17, %v163_v19  ;;  %v495_v27 = vrot.slane %v2703_v8, 6  ;;  %v511_v31 = vrot.slane %v2703_v8, 7 }
 0x121   :  { %v502_v32 = vrot.slane %v2705_v10, 6  ;;  %v515_v28 = vrot.slane %v2705_v10, 7  ;;  %v798_v2 = vrot.slane %v2703_v8, 5  ;;  %v2732_v7 = vsel %vm496_vm1, %v2703_v8, %v813_v5 }
 0x122   :  { %v2735_v6 = vsel %vm496_vm1, %v495_v27, %v494_v33  ;;  %v2739_v18 = vsel %vm496_vm1, %v511_v31, %v2687_v23  ;;  %v499_v19 = vrot.slane %v2721_v25, 6  ;;  %v513_v16 = vrot.slane %v2721_v25, 7 }
 0x123   :  { %v505_v17 = vrot.slane %v2723_v26, 6  ;;  %v819_v5 = vrot.slane %v2693_v30, 1  ;;  %v2751_v33 = vsel %vm473_vm0, %v2735_v6, %v2739_v18  ;;  %v2754_v27 = vsel %vm496_vm1, %v502_v32, %v501_v37 }
 0x124   :  { %3624 = vst [vmem:[#allocation35_spill] sm:$0xff] %v2754_v27  ;;  %v2758_v31 = vsel %vm496_vm1, %v515_v28, %v2689_v24  ;;  %v517_v4 = vrot.slane %v2723_v26, 7  ;;  %v2762_v3 = vsel %vm496_vm1, %v499_v19, %v498_v20  ;;  %v2766_v1 = vsel %vm496_vm1, %v513_v16, %v2691_v29 }
 0x125   :  { %3625 = vst [vmem:[#allocation36_spill] sm:$0xff] %v2758_v31  ;;  %3626 = vst [vmem:[#allocation37_spill] sm:$0xff] %v2762_v3  ;;  %v2769_v0 = vsel %vm496_vm1, %v798_v2, %v797_v12  ;;  %v804_v63 = vrot.slane %v2705_v10, 5  ;;  %v2773_v37 = vsel %vm496_vm1, %v505_v17, %v504_v14  ;;  %v2783_v20 = vsel %vm496_vm1, %v2705_v10, %v817_v15 }
 0x126   :  { %3627 = vst [vmem:[#allocation38_spill] sm:$0xff] %v2766_v1  ;;  %3628 = vst [vmem:[#allocation39_spill] sm:$0xff] %v2773_v37  ;;  %v2779_v32 = vsel %vm473_vm0, %v2769_v0, %v2732_v7  ;;  %v801_v28 = vrot.slane %v2721_v25, 5  ;;  %v2788_v2 = vsel %vm496_vm1, %v517_v4, %v2693_v30  ;;  %v2795_v14 = vsel %vm496_vm1, %v2721_v25, %v815_v36 }
 0x127   :  { %3629 = vst [vmem:[#allocation40_spill] sm:$0xff] %v2779_v32  ;;  %3630 = vst [vmem:[#allocation41_spill] sm:$0xff] %v2788_v2  ;;  %v2791_v12 = vsel %vm496_vm1, %v804_v63, %v803_v13  ;;  %v807_v19 = vrot.slane %v2723_v26, 5  ;;  %v2807_v4 = vsel %vm496_vm1, %v2723_v26, %v819_v5  ;;  %v940_v63 = vrot.slane %v2687_v23, 5 }
 0x128   :  { %v2803_v16 = vsel %vm496_vm1, %v801_v28, %v800_v22  ;;  %3632 = vst [vmem:[#allocation43_spill] sm:$0xff] %v2807_v4  ;;  %v941_v17 = vrot.slane %v2703_v8, 4  ;;  %v956_v15 = vrot.slane %v2687_v23, 2  ;;  %v957_v5 = vrot.slane %v2703_v8, 1 }
 0x129   :  { %3631 = vst [vmem:[#allocation42_spill] sm:$0xff] %v2803_v16  ;;  %v2815_v13 = vsel %vm496_vm1, %v807_v19, %v806_v35  ;;  %v946_v28 = vrot.slane %v2689_v24, 5  ;;  %v947_v32 = vrot.slane %v2705_v10, 4  ;;  %v962_v35 = vrot.slane %v2689_v24, 2 }
 0x12a   :  { %3633 = vst [vmem:[#allocation44_spill] sm:$0xff] %v2815_v13  ;;  %v942_v36 = vsel %vm496_vm1, %v941_v17, %v940_v63  ;;  %v963_v19 = vrot.slane %v2705_v10, 1  ;;  %v943_v62 = vrot.slane %v2691_v29, 5  ;;  %v958_v61 = vsel %vm496_vm1, %v957_v5, %v956_v15 }
 0x12b   :  { %v2832_v60 = vsel %vm496_vm1, %v947_v32, %v946_v28  ;;  %v944_v22 = vrot.slane %v2721_v25, 4  ;;  %v959_v59 = vrot.slane %v2691_v29, 2  ;;  %v2838_v58 = vsel %vm473_vm0, %v942_v36, %v958_v61 }
 0x12c   :  { %3634 = vst [vmem:[#allocation45_spill] sm:$0xff] %v2838_v58  ;;  %v2841_v63 = vsel %vm496_vm1, %v963_v19, %v962_v35  ;;  %v960_v17 = vrot.slane %v2721_v25, 1  ;;  %v949_v57 = vrot.slane %v2693_v30, 5  ;;  %v950_v5 = vrot.slane %v2723_v26, 4  ;;  %v3704_v11 = vld [vmem:[#allocation36_spill] sm:$0xff] }
 0x12d   :  { %v2850_v15 = vsel %vm496_vm1, %v944_v22, %v943_v62  ;;  %v965_v28 = vrot.slane %v2693_v30, 2  ;;  %v966_v35 = vrot.slane %v2723_v26, 1  ;;  %v1087_v19 = vrot.slane %v2687_v23, 4 }
 0x12e   :  { %v2855_v58 = vsel %vm496_vm1, %v960_v17, %v959_v59  ;;  %v1088_v56 = vrot.slane %v2703_v8, 3  ;;  %v2865_v62 = vsel %vm496_vm1, %v950_v5, %v949_v57  ;;  %v1103_v22 = vrot.slane %v2687_v23, 3 }
 0x12f   :  { %v1104_v55 = vrot.slane %v2703_v8, 2  ;;  %v2870_v59 = vsel %vm496_vm1, %v966_v35, %v965_v28  ;;  %v1094_v53 = vrot.slane %v2705_v10, 3  ;;  %v1109_v23 = vrot.slane %v2689_v24, 3 }
 0x130   :  { %v1089_v17 = vsel %vm496_vm1, %v1088_v56, %v1087_v19  ;;  %v1110_v8 = vrot.slane %v2705_v10, 2  ;;  %v1090_v28 = vrot.slane %v2691_v29, 4  ;;  %v1091_v35 = vrot.slane %v2721_v25, 3 }
 0x131   :  { %v1105_v57 = vsel %vm496_vm1, %v1104_v55, %v1103_v22  ;;  %v2887_v56 = vsel %vm496_vm1, %v1094_v53, %v1093_v54  ;;  %v1106_v55 = vrot.slane %v2691_v29, 3  ;;  %v1107_v24 = vrot.slane %v2721_v25, 2 }
 0x132   :  { %v2884_v5 = vsel %vm473_vm0, %v1089_v17, %v1105_v57  ;;  %3635 = vst [vmem:[#allocation46_spill] sm:$0xff] %v2887_v56  ;;  %v2892_v19 = vsel %vm496_vm1, %v1110_v8, %v1109_v23  ;;  %v1096_v10 = vrot.slane %v2693_v30, 4  ;;  %v2902_v53 = vsel %vm496_vm1, %v1091_v35, %v1090_v28 }
 0x133   :  { %3636 = vst [vmem:[#allocation47_spill] sm:$0xff] %v2892_v19  ;;  %3637 = vst [vmem:[#allocation48_spill] sm:$0xff] %v2902_v53  ;;  %v1097_v54 = vrot.slane %v2723_v26, 3  ;;  %v1112_v32 = vrot.slane %v2693_v30, 3  ;;  %v2907_v23 = vsel %vm496_vm1, %v1107_v24, %v1106_v55  ;;  %v1113_v29 = vrot.slane %v2723_v26, 2 }
 0x134   :  { %3638 = vst [vmem:[#allocation49_spill] sm:$0xff] %v2907_v23  ;;  %v2912_v25 = vsel %vm473_vm0, %v1105_v57, %v1089_v17  ;;  %v2931_v17 = vsel %vm473_vm0, %v958_v61, %v942_v36  ;;  %v524_v24 = vsel %vm2707_vm3, %v2762_v3, %v2766_v1  ;;  %v3664_v3 = vld [vmem:[#allocation40_spill] sm:$0xff] }
 0x135   :  { %3639 = vst [vmem:[#allocation50_spill] sm:$0xff] %v2912_v25  ;;  %v2923_v30 = vsel %vm496_vm1, %v1097_v54, %v1096_v10  ;;  %3641 = vst [vmem:[#allocation52_spill] sm:$0xff] %v2931_v17  ;;  %v2934_v57 = vsel %vm496_vm1, %v1113_v29, %v1112_v32  ;;  %v2960_v54 = vsel %vm473_vm0, %v2732_v7, %v2769_v0 }
 0x136   :  { %3640 = vst [vmem:[#allocation51_spill] sm:$0xff] %v2923_v30  ;;  %3642 = vst [vmem:[#allocation53_spill] sm:$0xff] %v2934_v57  ;;  %v3665_v25 = vsel %vm2707_vm3, %v2803_v16, %v2795_v14 }
 0x137   :  { %3643 = vst [vmem:[#allocation54_spill] sm:$0xff] %v2960_v54 }
 0x139   :  { %v721_v61 = vpop.f32.mrf.mxu0  ;;  %v762_v36 = vpop.f32.mrf.mxu1 }
 0x13a   :  { %v769_v35 = vadd.f32 %v721_v61, %v2751_v33  ;;  %v2983_v33 = vsel %vm473_vm0, %v2739_v18, %v2735_v6  ;;  %v526_v61 = vsel %vm2714_vm4, %v2773_v37, %v2788_v2 }
 0x13b   :  { %v723_v7 = vpop.f32.mrf.mxu0  ;;  %v764_v8 = vpop.f32.mrf.mxu1  ;;  %3644 = vst [vmem:[#allocation55_spill] sm:$0xff] %v2983_v33 }
 0x13c   :  { %v2076_v55 = vmul.f32 -1.442695, %v769_v35  ;;  %v770_v10 = vadd.f32 %v723_v7, %v524_v24  ;;  %v772_v29 = vadd.f32 %v764_v8, %v526_v61  ;;  %v525_v35 = vsel %vm2697_vm2, %v2754_v27, %v2758_v31  ;;  %v3662_v27 = vld [vmem:[#allocation15_spill] sm:$0xff]  ;;  %v3663_v31 = vld [vmem:[#allocation16_spill] sm:$0xff] }
 0x13d   :  { %v725_v26 = vpop.f32.mrf.mxu0  ;;  %v766_v6 = vpop.f32.mrf.mxu1 }
 0x13e   :  { %2208 = vpow2.f32 %v2076_v55  ;;  %v2077_v18 = vmul.f32 -1.442695, %v770_v10  ;;  %v2078_v28 = vmul.f32 -1.442695, %v772_v29  ;;  %v771_v26 = vadd.f32 %v762_v36, %v525_v35 }
 0x13f   :  { %v726_v22 = vpop.f32.mrf.mxu0  ;;  %v767_v32 = vpop.f32.mrf.mxu1 }
 0x140   :  { %2210 = vpow2.f32 %v2077_v18 }
 0x141   :  { %2212 = vpow2.f32 %v2078_v28 }
 0x14b   :  { %v2209_v24 = vpop.eup %2208 }
 0x14c   :  { %v776_v7 = vadd.f32 1.0, %v2209_v24 }
 0x14d   :  { %v2211_v55 = vpop.eup %2210 }
 0x14e   :  { %2214 = vrcp.f32 %v776_v7  ;;  %v782_v22 = vadd.f32 1.0, %v2211_v55  ;;  %v2213_v32 = vpop.eup %2212  ;;  %v3647_v7 = vld [vmem:[#allocation17_spill] sm:$0xff]  ;;  %v3648_v55 = vld [vmem:[#allocation18_spill] sm:$0xff] }
 0x14f   :  { %2216 = vtanh.f32 %v771_v26  ;;  %v789_v8 = vadd.f32 1.0, %v2213_v32  ;;  %v3646_v26 = vmov 0   ;;  %v3650_v32 = vld [vmem:[#allocation20_spill] sm:$0xff] }
 0x150   :  { %2218 = vrcp.f32 %v782_v22  ;;  %v3649_v22 = vld [vmem:[#allocation19_spill] sm:$0xff] }
 0x151   :  { %2220 = vrcp.f32 %v789_v8  ;;  %v3654_v8 = vld [vmem:[#allocation24_spill] sm:$0xff] }
 0x15b   :  { %v2215_v10 = vpop.eup %2214 }
 0x15c   :  { %v2217_v6 = vpop.eup %2216 }
 0x15d   :  { %v2219_v18 = vpop.eup %2218  ;;  %v793_v61 = vmul.f32 %v2217_v6, %v2215_v10  ;;  %v3651_v10 = vld [vmem:[#allocation21_spill] sm:$0xff]  ;;  %v3652_v6 = vld [vmem:[#allocation22_spill] sm:$0xff] }
 0x15e   :  { %v792_v29 = vmul.f32 0.0, %v2219_v18  ;;  %v2221_v36 = vpop.eup %2220  ;;  %v3653_v18 = vld [vmem:[#allocation23_spill] sm:$0xff] }
 0x160   :  { %v3005_v0 = vadd.f32 %v793_v61, %v792_v29  ;;  %v3655_v29 = vld [vmem:[#allocation25_spill] sm:$0xff]  ;;  %v3656_v61 = vld [vmem:[#allocation26_spill] sm:$0xff] }
 0x162   :  { %2222 = vtanh.f32 %v3005_v0 }
 0x16f   :  { %v2223_v35 = vpop.eup %2222 }
 0x170   :  { %v3008_v24 = vmul.f32 %v2223_v35, %v2221_v36  ;;  %v3657_v36 = vld [vmem:[#allocation27_spill] sm:$0xff]  ;;  %v3658_v35 = vld [vmem:[#allocation28_spill] sm:$0xff] }
 0x172   :  { %3645 = vst [vmem:[#allocation56_spill] sm:$0xff] %v3008_v24  ;;  %v829_v28 = vpack.c.bf16 %v3008_v24, %v3008_v24  ;;  %v3660_v24 = vld [vmem:[#allocation30_spill] sm:$0xff] }
 0x174   :  { %863 = vmatmul.mubr.bf16.vlgmr.msra.gmra.mxu0 %v829_v28  ;;  %904 = vmatmul.mubr.bf16.vlgmr.msra.gmra.mxu1 %v829_v28  ;;  %v3659_v28 = vld [vmem:[#allocation29_spill] sm:$0xff] }
 0x175   :  { %978 = vmatpush1.bf16.msra.mxu0 %v2538_v38  ;;  %1019 = vmatpush1.bf16.msra.mxu1 %v2540_v39 }
 0x176   :  { %979 = vmatprep.subr.bf16.mxu0 %v2542_v40  ;;  %1020 = vmatprep.subr.bf16.mxu1 %v2546_v41 }
 0x177   :  { %1009 = vmatprep.mubr.bf16.mxu0 %v3646_v26  ;;  %1050 = vmatprep.mubr.bf16.mxu1 %v3646_v26 }
 0x179   :  { %980 = vmatpush1.bf16.msra.mxu0 %v2548_v42  ;;  %1021 = vmatpush1.bf16.msra.mxu1 %v2552_v43 }
 0x17a   :  { %981 = vmatprep.subr.bf16.mxu0 %v2556_v44  ;;  %1022 = vmatprep.subr.bf16.mxu1 %v2558_v45 }
 0x17d   :  { %982 = vmatpush1.bf16.msra.mxu0 %v2562_v46  ;;  %1023 = vmatpush1.bf16.msra.mxu1 %v2566_v47 }
 0x17e   :  { %983 = vmatprep.subr.bf16.mxu0 %v2568_v48  ;;  %1024 = vmatprep.subr.bf16.mxu1 %v2572_v49 }
 0x181   :  { %984 = vmatpush1.bf16.msra.mxu0 %v2576_v50  ;;  %1025 = vmatpush1.bf16.msra.mxu1 %v2578_v51 }
 0x182   :  { %985 = vmatprep.subr.bf16.mxu0 %v2582_v52  ;;  %1026 = vmatprep.subr.bf16.mxu1 %v3647_v7 }
 0x185   :  { %986 = vmatpush1.bf16.msra.mxu0 %v3648_v55  ;;  %1027 = vmatpush1.bf16.msra.mxu1 %v3649_v22 }
 0x186   :  { %987 = vmatprep.subr.bf16.mxu0 %v3650_v32  ;;  %1028 = vmatprep.subr.bf16.mxu1 %v3651_v10 }
 0x189   :  { %988 = vmatpush1.bf16.msra.mxu0 %v3652_v6  ;;  %1029 = vmatpush1.bf16.msra.mxu1 %v3653_v18 }
 0x18a   :  { %989 = vmatprep.subr.bf16.mxu0 %v3654_v8  ;;  %1030 = vmatprep.subr.bf16.mxu1 %v3655_v29 }
 0x18d   :  { %990 = vmatpush1.bf16.msra.mxu0 %v3656_v61  ;;  %1031 = vmatpush1.bf16.msra.mxu1 %v3657_v36 }
 0x18e   :  { %991 = vmatprep.subr.bf16.mxu0 %v3658_v35  ;;  %1032 = vmatprep.subr.bf16.mxu1 %v3659_v28 }
 0x191   :  { %992 = vmatpush1.bf16.msra.mxu0 %v3660_v24  ;;  %1033 = vmatpush1.bf16.msra.mxu1 %v3661_v9 }
 0x192   :  { %1124 = vmatprep.subr.bf16.mxu0 %v3662_v27  ;;  %1165 = vmatprep.subr.bf16.mxu1 %v3663_v31 }
 0x234   :  { %v864_v37 = vpop.f32.mrf.mxu0  ;;  %v905_v2 = vpop.f32.mrf.mxu1 }
 0x235   :  { %v912_v1 = vadd.f32 %v864_v37, %v3664_v3  ;;  %v3666_v3 = vsel %vm2714_vm4, %v2815_v13, %v2807_v4 }
 0x236   :  { %v866_v33 = vpop.f32.mrf.mxu0  ;;  %v907_v54 = vpop.f32.mrf.mxu1 }
 0x237   :  { %v2079_v17 = vmul.f32 -1.442695, %v912_v1  ;;  %v913_v19 = vadd.f32 %v866_v33, %v3665_v25  ;;  %v915_v37 = vadd.f32 %v907_v54, %v3666_v3  ;;  %v3667_v1 = vsel %vm2697_vm2, %v2791_v12, %v2783_v20 }
 0x238   :  { %v868_v56 = vpop.f32.mrf.mxu0  ;;  %v909_v57 = vpop.f32.mrf.mxu1  ;;  %v914_v16 = vadd.f32 %v905_v2, %v3667_v1 }
 0x239   :  { %2224 = vpow2.f32 %v2079_v17  ;;  %v2080_v30 = vmul.f32 -1.442695, %v913_v19  ;;  %v2081_v25 = vmul.f32 -1.442695, %v915_v37 }
 0x23a   :  { %v869_v23 = vpop.f32.mrf.mxu0  ;;  %v910_v53 = vpop.f32.mrf.mxu1 }
 0x23b   :  { %2226 = vpow2.f32 %v2080_v30 }
 0x23c   :  { %2228 = vtanh.f32 %v914_v16 }
 0x23d   :  { %2230 = vpow2.f32 %v2081_v25  ;;  %v3669_v25 = vld [vmem:[#allocation45_spill] sm:$0xff] }
 0x246   :  { %v2225_v56 = vpop.eup %2224 }
 0x247   :  { %v919_v57 = vadd.f32 1.0, %v2225_v56 }
 0x248   :  { %v2227_v19 = vpop.eup %2226 }
 0x249   :  { %2232 = vrcp.f32 %v919_v57  ;;  %v925_v53 = vadd.f32 1.0, %v2227_v19  ;;  %v2229_v23 = vpop.eup %2228 }
 0x24a   :  { %v2231_v30 = vpop.eup %2230 }
 0x24b   :  { %2234 = vrcp.f32 %v925_v53  ;;  %v932_v3 = vadd.f32 1.0, %v2231_v30 }
 0x24d   :  { %2236 = vrcp.f32 %v932_v3 }
 0x256   :  { %v2233_v17 = vpop.eup %2232 }
 0x257   :  { %v936_v33 = vmul.f32 %v2233_v17, %v2229_v23  ;;  %v3670_v23 = vsel %vm2707_vm3, %v2850_v15, %v2855_v58 }
 0x258   :  { %v2235_v54 = vpop.eup %2234 }
 0x259   :  { %v935_v13 = vmul.f32 %v2235_v54, %v3005_v0 }
 0x25a   :  { %v2237_v2 = vpop.eup %2236 }
 0x25b   :  { %v3063_v4 = vadd.f32 %v936_v33, %v935_v13 }
 0x25d   :  { %2238 = vtanh.f32 %v3063_v4 }
 0x26a   :  { %v2239_v16 = vpop.eup %2238 }
 0x26b   :  { %v3066_v37 = vmul.f32 %v2239_v16, %v2237_v2  ;;  %v3671_v16 = vsel %vm2714_vm4, %v2865_v62, %v2870_v59 }
 0x26d   :  { %3668 = vst [vmem:[#allocation17_spill] sm:$0xff] %v3066_v37  ;;  %v976_v1 = vpack.c.bf16 %v3066_v37, %v3066_v37 }
 0x26f   :  { %1010 = vmatmul.mubr.bf16.vlgmr.msra.gmra.mxu0 %v976_v1  ;;  %1051 = vmatmul.mubr.bf16.vlgmr.msra.gmra.mxu1 %v976_v1 }
 0x270   :  { %1125 = vmatpush1.bf16.msra.mxu0 %v2538_v38  ;;  %1166 = vmatpush1.bf16.msra.mxu1 %v2540_v39 }
 0x271   :  { %1126 = vmatprep.subr.bf16.mxu0 %v2542_v40  ;;  %1167 = vmatprep.subr.bf16.mxu1 %v2546_v41 }
 0x272   :  { %1156 = vmatprep.mubr.bf16.mxu0 %v3646_v26  ;;  %1197 = vmatprep.mubr.bf16.mxu1 %v3646_v26 }
 0x274   :  { %1127 = vmatpush1.bf16.msra.mxu0 %v2548_v42  ;;  %1168 = vmatpush1.bf16.msra.mxu1 %v2552_v43 }
 0x275   :  { %1128 = vmatprep.subr.bf16.mxu0 %v2556_v44  ;;  %1169 = vmatprep.subr.bf16.mxu1 %v2558_v45 }
 0x278   :  { %1129 = vmatpush1.bf16.msra.mxu0 %v2562_v46  ;;  %1170 = vmatpush1.bf16.msra.mxu1 %v2566_v47 }
 0x279   :  { %1130 = vmatprep.subr.bf16.mxu0 %v2568_v48  ;;  %1171 = vmatprep.subr.bf16.mxu1 %v2572_v49 }
 0x27c   :  { %1131 = vmatpush1.bf16.msra.mxu0 %v2576_v50  ;;  %1172 = vmatpush1.bf16.msra.mxu1 %v2578_v51 }
 0x27d   :  { %1132 = vmatprep.subr.bf16.mxu0 %v2582_v52  ;;  %1173 = vmatprep.subr.bf16.mxu1 %v3647_v7 }
 0x280   :  { %1133 = vmatpush1.bf16.msra.mxu0 %v3648_v55  ;;  %1174 = vmatpush1.bf16.msra.mxu1 %v3649_v22 }
 0x281   :  { %1134 = vmatprep.subr.bf16.mxu0 %v3650_v32  ;;  %1175 = vmatprep.subr.bf16.mxu1 %v3651_v10 }
 0x284   :  { %1135 = vmatpush1.bf16.msra.mxu0 %v3652_v6  ;;  %1176 = vmatpush1.bf16.msra.mxu1 %v3653_v18 }
 0x285   :  { %1136 = vmatprep.subr.bf16.mxu0 %v3654_v8  ;;  %1177 = vmatprep.subr.bf16.mxu1 %v3655_v29 }
 0x288   :  { %1137 = vmatpush1.bf16.msra.mxu0 %v3656_v61  ;;  %1178 = vmatpush1.bf16.msra.mxu1 %v3657_v36 }
 0x289   :  { %1138 = vmatprep.subr.bf16.mxu0 %v3658_v35  ;;  %1179 = vmatprep.subr.bf16.mxu1 %v3659_v28 }
 0x28c   :  { %1139 = vmatpush1.bf16.msra.mxu0 %v3660_v24  ;;  %1180 = vmatpush1.bf16.msra.mxu1 %v3661_v9 }
 0x28d   :  { %1239 = vmatprep.subr.bf16.mxu0 %v3662_v27  ;;  %1280 = vmatprep.subr.bf16.mxu1 %v3663_v31 }
 0x32f   :  { %v1011_v13 = vpop.f32.mrf.mxu0  ;;  %v1052_v0 = vpop.f32.mrf.mxu1 }
 0x330   :  { %v1059_v56 = vadd.f32 %v1011_v13, %v3669_v25  ;;  %v3672_v13 = vsel %vm2697_vm2, %v2832_v60, %v2841_v63 }
 0x331   :  { %v1013_v57 = vpop.f32.mrf.mxu0  ;;  %v1054_v19 = vpop.f32.mrf.mxu1  ;;  %v1061_v25 = vadd.f32 %v1052_v0, %v3672_v13 }
 0x332   :  { %v2082_v53 = vmul.f32 -1.442695, %v1059_v56  ;;  %v1060_v30 = vadd.f32 %v1013_v57, %v3670_v23  ;;  %v1062_v1 = vadd.f32 %v1054_v19, %v3671_v16 }
 0x333   :  { %v1015_v17 = vpop.f32.mrf.mxu0  ;;  %v1056_v33 = vpop.f32.mrf.mxu1 }
 0x334   :  { %2240 = vpow2.f32 %v2082_v53  ;;  %v2083_v54 = vmul.f32 -1.442695, %v1060_v30  ;;  %v2084_v56 = vmul.f32 -1.442695, %v1062_v1 }
 0x335   :  { %v1016_v3 = vpop.f32.mrf.mxu0  ;;  %v1057_v2 = vpop.f32.mrf.mxu1 }
 0x336   :  { %2242 = vpow2.f32 %v2083_v54 }
 0x337   :  { %2244 = vtanh.f32 %v1061_v25 }
 0x338   :  { %2246 = vpow2.f32 %v2084_v56  ;;  %v3680_v56 = vld [vmem:[#allocation47_spill] sm:$0xff] }
 0x341   :  { %v2241_v57 = vpop.eup %2240 }
 0x342   :  { %v1066_v23 = vadd.f32 1.0, %v2241_v57 }
 0x343   :  { %v2243_v53 = vpop.eup %2242 }
 0x344   :  { %2248 = vrcp.f32 %v1066_v23  ;;  %v1072_v30 = vadd.f32 1.0, %v2243_v53  ;;  %v2245_v17 = vpop.eup %2244 }
 0x345   :  { %v2247_v33 = vpop.eup %2246 }
 0x346   :  { %2250 = vrcp.f32 %v1072_v30  ;;  %v1079_v2 = vadd.f32 1.0, %v2247_v33 }
 0x348   :  { %2252 = vrcp.f32 %v1079_v2 }
 0x351   :  { %v2249_v54 = vpop.eup %2248 }
 0x352   :  { %v1083_v3 = vmul.f32 %v2249_v54, %v2245_v17 }
 0x353   :  { %v2251_v19 = vpop.eup %2250 }
 0x354   :  { %v1082_v16 = vmul.f32 %v2251_v19, %v3063_v4 }
 0x355   :  { %v2253_v0 = vpop.eup %2252 }
 0x356   :  { %v3121_v37 = vadd.f32 %v1083_v3, %v1082_v16 }
 0x358   :  { %2254 = vtanh.f32 %v3121_v37 }
 0x365   :  { %v2255_v1 = vpop.eup %2254 }
 0x366   :  { %v3124_v13 = vmul.f32 %v2255_v1, %v2253_v0 }
 0x368   :  { %v1123_v25 = vpack.c.bf16 %v3124_v13, %v3124_v13 }
 0x36a   :  { %1157 = vmatmul.mubr.bf16.vlgmr.msra.gmra.mxu0 %v1123_v25  ;;  %1198 = vmatmul.mubr.bf16.vlgmr.msra.gmra.mxu1 %v1123_v25 }
 0x36b   :  { %1240 = vmatpush1.bf16.msra.mxu0 %v2538_v38  ;;  %1281 = vmatpush1.bf16.msra.mxu1 %v2540_v39 }
 0x36c   :  { %1241 = vmatprep.subr.bf16.mxu0 %v2542_v40  ;;  %1282 = vmatprep.subr.bf16.mxu1 %v2546_v41 }
 0x36d   :  { %1271 = vmatprep.mubr.bf16.mxu0 %v3646_v26  ;;  %1312 = vmatprep.mubr.bf16.mxu1 %v3646_v26 }
 0x36f   :  { %1242 = vmatpush1.bf16.msra.mxu0 %v2548_v42  ;;  %1283 = vmatpush1.bf16.msra.mxu1 %v2552_v43 }
 0x370   :  { %1243 = vmatprep.subr.bf16.mxu0 %v2556_v44  ;;  %1284 = vmatprep.subr.bf16.mxu1 %v2558_v45  ;;  %v3673_v44 = vld [vmem:[#allocation48_spill] sm:$0xff]  ;;  %v3674_v45 = vld [vmem:[#allocation49_spill] sm:$0xff] }
 0x373   :  { %1244 = vmatpush1.bf16.msra.mxu0 %v2562_v46  ;;  %1285 = vmatpush1.bf16.msra.mxu1 %v2566_v47  ;;  %v3675_v46 = vsel %vm2707_vm3, %v3673_v44, %v3674_v45 }
 0x374   :  { %1245 = vmatprep.subr.bf16.mxu0 %v2568_v48  ;;  %1286 = vmatprep.subr.bf16.mxu1 %v2572_v49 }
 0x377   :  { %1246 = vmatpush1.bf16.msra.mxu0 %v2576_v50  ;;  %1287 = vmatpush1.bf16.msra.mxu1 %v2578_v51 }
 0x378   :  { %1247 = vmatprep.subr.bf16.mxu0 %v2582_v52  ;;  %1288 = vmatprep.subr.bf16.mxu1 %v3647_v7  ;;  %v3679_v7 = vld [vmem:[#allocation46_spill] sm:$0xff] }
 0x379   :  { %v3681_v57 = vsel %vm2697_vm2, %v3679_v7, %v3680_v56 }
 0x37b   :  { %1248 = vmatpush1.bf16.msra.mxu0 %v3648_v55  ;;  %1289 = vmatpush1.bf16.msra.mxu1 %v3649_v22 }
 0x37c   :  { %1249 = vmatprep.subr.bf16.mxu0 %v3650_v32  ;;  %1290 = vmatprep.subr.bf16.mxu1 %v3651_v10 }
 0x37f   :  { %1250 = vmatpush1.bf16.msra.mxu0 %v3652_v6  ;;  %1291 = vmatpush1.bf16.msra.mxu1 %v3653_v18 }
 0x380   :  { %1251 = vmatprep.subr.bf16.mxu0 %v3654_v8  ;;  %1292 = vmatprep.subr.bf16.mxu1 %v3655_v29 }
 0x383   :  { %1252 = vmatpush1.bf16.msra.mxu0 %v3656_v61  ;;  %1293 = vmatpush1.bf16.msra.mxu1 %v3657_v36 }
 0x384   :  { %1253 = vmatprep.subr.bf16.mxu0 %v3658_v35  ;;  %1294 = vmatprep.subr.bf16.mxu1 %v3659_v28 }
 0x387   :  { %1254 = vmatpush1.bf16.msra.mxu0 %v3660_v24  ;;  %1295 = vmatpush1.bf16.msra.mxu1 %v3661_v9 }
 0x388   :  { %1354 = vmatprep.subr.bf16.mxu0 %v3662_v27  ;;  %1395 = vmatprep.subr.bf16.mxu1 %v3663_v31  ;;  %v3676_v27 = vld [vmem:[#allocation51_spill] sm:$0xff]  ;;  %v3677_v31 = vld [vmem:[#allocation53_spill] sm:$0xff] }
 0x389   :  { %v3678_v4 = vsel %vm2714_vm4, %v3676_v27, %v3677_v31 }
 0x42a   :  { %v1158_v38 = vpop.f32.mrf.mxu0  ;;  %v1199_v39 = vpop.f32.mrf.mxu1 }
 0x42b   :  { %v1206_v40 = vadd.f32 %v1158_v38, %v2884_v5  ;;  %v1208_v23 = vadd.f32 %v1199_v39, %v3681_v57  ;;  %v3221_v57 = vld [vmem:[#allocation8 + $0x8c] ss:$16 sps:$4 sm:$0xff]  }
 0x42c   :  { %v1160_v41 = vpop.f32.mrf.mxu0  ;;  %v1201_v42 = vpop.f32.mrf.mxu1 }
 0x42d   :  { %v2085_v43 = vmul.f32 -1.442695, %v1206_v40  ;;  %v1207_v47 = vadd.f32 %v1160_v41, %v3675_v46  ;;  %v1209_v5 = vadd.f32 %v1201_v42, %v3678_v4  ;;  %v3189_v46 = vld [vmem:[#allocation8 + $0xe8] ss:$16 sps:$4 sm:$0xff]  }
 0x42e   :  { %v1162_v48 = vpop.f32.mrf.mxu0  ;;  %v1203_v49 = vpop.f32.mrf.mxu1  ;;  %v3215_v4 = vld [vmem:[#allocation8 + $0xa8] ss:$16 sps:$4 sm:$0xff]  }
 0x42f   :  { %2256 = vpow2.f32 %v2085_v43  ;;  %v2086_v50 = vmul.f32 -1.442695, %v1207_v47  ;;  %v2087_v53 = vmul.f32 -1.442695, %v1209_v5  ;;  %v3186_v43 = vld [vmem:[#allocation8 + $0xe0] ss:$16 sps:$4 sm:$0xff]  }
 0x430   :  { %v1163_v51 = vpop.f32.mrf.mxu0  ;;  %v1204_v52 = vpop.f32.mrf.mxu1  ;;  %v3195_v47 = vld [vmem:[#allocation8 + $0xcc] ss:$16 sps:$4 sm:$0xff]   ;;  %v3200_v48 = vld [vmem:[#allocation8 + $0xc0] ss:$16 sps:$4 sm:$0xff]   ;;  %v3203_v49 = vld [vmem:[#allocation8 + $0xc8] ss:$16 sps:$4 sm:$0xff]  }
 0x431   :  { %2258 = vpow2.f32 %v2086_v50  ;;  %v3206_v50 = vld [vmem:[#allocation8 + $0xa4] ss:$16 sps:$4 sm:$0xff]   ;;  %v3209_v51 = vld [vmem:[#allocation8 + $0xac] ss:$16 sps:$4 sm:$0xff]   ;;  %v3212_v52 = vld [vmem:[#allocation8 + $0xa0] ss:$16 sps:$4 sm:$0xff]  }
 0x432   :  { %2260 = vtanh.f32 %v1208_v23  ;;  %v3218_v5 = vld [vmem:[#allocation8 + $0x84] ss:$16 sps:$4 sm:$0xff]   ;;  %v3224_v23 = vld [vmem:[#allocation8 + $0x80] ss:$16 sps:$4 sm:$0xff]  }
 0x433   :  { %2262 = vpow2.f32 %v2087_v53  ;;  %v3227_v53 = vld [vmem:[#allocation8 + $0x88] ss:$16 sps:$4 sm:$0xff]  }
 0x43c   :  { %v2257_v30 = vpop.eup %2256 }
 0x43d   :  { %v1213_v17 = vadd.f32 1.0, %v2257_v30  ;;  %v3230_v30 = vld [vmem:[#allocation8 + $0x64] ss:$16 sps:$4 sm:$0xff]  }
 0x43e   :  { %v2259_v33 = vpop.eup %2258 }
 0x43f   :  { %2264 = vrcp.f32 %v1213_v17  ;;  %v1219_v54 = vadd.f32 1.0, %v2259_v33  ;;  %v2261_v3 = vpop.eup %2260  ;;  %v3233_v17 = vld [vmem:[#allocation8 + $0x6c] ss:$16 sps:$4 sm:$0xff]  }
 0x440   :  { %v2263_v19 = vpop.eup %2262 }
 0x441   :  { %2266 = vrcp.f32 %v1219_v54  ;;  %v1226_v1 = vadd.f32 1.0, %v2263_v19 }
 0x443   :  { %2268 = vrcp.f32 %v1226_v1 }
 0x44c   :  { %v2265_v2 = vpop.eup %2264 }
 0x44d   :  { %v1230_v16 = vmul.f32 %v2265_v2, %v2261_v3  ;;  %v3684_v3 = vsel %vm2714_vm4, %v3677_v31, %v3676_v27  ;;  %v3685_v2 = vsel %vm2697_vm2, %v3680_v56, %v3679_v7 }
 0x44e   :  { %v2267_v0 = vpop.eup %2266 }
 0x44f   :  { %v1229_v25 = vmul.f32 %v2267_v0, %v3121_v37  ;;  %v3192_v37 = vld [vmem:[#allocation8 + $0xc4] ss:$16 sps:$4 sm:$0xff]  }
 0x450   :  { %v2269_v39 = vpop.eup %2268 }
 0x451   :  { %v3179_v38 = vadd.f32 %v1230_v16, %v1229_v25 }
 0x453   :  { %2270 = vtanh.f32 %v3179_v38 }
 0x460   :  { %v2271_v40 = vpop.eup %2270 }
 0x461   :  { %v3182_v41 = vmul.f32 %v2271_v40, %v2269_v39 }
 0x463   :  { %v1238_v42 = vpack.c.bf16 %v3182_v41, %v3182_v41 }
 0x465   :  { %1272 = vmatmul.mubr.bf16.vlgmr.msra.gmra.mxu0 %v1238_v42  ;;  %1313 = vmatmul.mubr.bf16.vlgmr.msra.gmra.mxu1 %v1238_v42 }
 0x466   :  { %1355 = vmatpush1.bf16.msra.mxu0 %v3186_v43  ;;  %1396 = vmatpush1.bf16.msra.mxu1 %v3189_v46 }
 0x467   :  { %1356 = vmatprep.subr.bf16.mxu0 %v3192_v37  ;;  %1397 = vmatprep.subr.bf16.mxu1 %v3195_v47 }
 0x468   :  { %1386 = vmatprep.mubr.bf16.mxu0 %v3646_v26  ;;  %1427 = vmatprep.mubr.bf16.mxu1 %v3646_v26 }
 0x46a   :  { %1357 = vmatpush1.bf16.msra.mxu0 %v3200_v48  ;;  %1398 = vmatpush1.bf16.msra.mxu1 %v3203_v49 }
 0x46b   :  { %1358 = vmatprep.subr.bf16.mxu0 %v3206_v50  ;;  %1399 = vmatprep.subr.bf16.mxu1 %v3209_v51 }
 0x46e   :  { %1359 = vmatpush1.bf16.msra.mxu0 %v3212_v52  ;;  %1400 = vmatpush1.bf16.msra.mxu1 %v3215_v4 }
 0x46f   :  { %1360 = vmatprep.subr.bf16.mxu0 %v3218_v5  ;;  %1401 = vmatprep.subr.bf16.mxu1 %v3221_v57 }
 0x472   :  { %1361 = vmatpush1.bf16.msra.mxu0 %v3224_v23  ;;  %1402 = vmatpush1.bf16.msra.mxu1 %v3227_v53 }
 0x473   :  { %1362 = vmatprep.subr.bf16.mxu0 %v3230_v30  ;;  %1403 = vmatprep.subr.bf16.mxu1 %v3233_v17 }
 0x476   :  { %1363 = vmatpush1.bf16.msra.mxu0 %v3648_v55  ;;  %1404 = vmatpush1.bf16.msra.mxu1 %v3649_v22  ;;  %v3250_v55 = vld [vmem:[#allocation8 + $0xe4] ss:$16 sps:$4 sm:$0xff]   ;;  %v3253_v22 = vld [vmem:[#allocation8 + $0xec] ss:$16 sps:$4 sm:$0xff]  }
 0x477   :  { %1364 = vmatprep.subr.bf16.mxu0 %v3650_v32  ;;  %1405 = vmatprep.subr.bf16.mxu1 %v3651_v10 }
 0x47a   :  { %1365 = vmatpush1.bf16.msra.mxu0 %v3652_v6  ;;  %1406 = vmatpush1.bf16.msra.mxu1 %v3653_v18  ;;  %v3682_v6 = vld [vmem:[#allocation50_spill] sm:$0xff] }
 0x47b   :  { %1366 = vmatprep.subr.bf16.mxu0 %v3654_v8  ;;  %1407 = vmatprep.subr.bf16.mxu1 %v3655_v29 }
 0x47e   :  { %1367 = vmatpush1.bf16.msra.mxu0 %v3656_v61  ;;  %1408 = vmatpush1.bf16.msra.mxu1 %v3657_v36 }
 0x47f   :  { %1368 = vmatprep.subr.bf16.mxu0 %v3658_v35  ;;  %1409 = vmatprep.subr.bf16.mxu1 %v3659_v28 }
 0x482   :  { %1369 = vmatpush1.bf16.msra.mxu0 %v3660_v24  ;;  %1410 = vmatpush1.bf16.msra.mxu1 %v3661_v9  ;;  %v3683_v9 = vsel %vm2707_vm3, %v3674_v45, %v3673_v44 }
 0x483   :  { %1469 = vmatprep.subr.bf16.mxu0 %v3250_v55  ;;  %1510 = vmatprep.subr.bf16.mxu1 %v3253_v22 }
 0x525   :  { %v1273_v32 = vpop.f32.mrf.mxu0  ;;  %v1314_v10 = vpop.f32.mrf.mxu1 }
 0x526   :  { %v1321_v18 = vadd.f32 %v1273_v32, %v3682_v6  ;;  %v1323_v44 = vadd.f32 %v1314_v10, %v3685_v2  ;;  %v3334_v2 = vld [vmem:[#allocation8] ss:$16 sps:$4 sm:$0xff]  }
 0x527   :  { %v1275_v8 = vpop.f32.mrf.mxu0  ;;  %v1316_v29 = vpop.f32.mrf.mxu1 }
 0x528   :  { %v2088_v61 = vmul.f32 -1.442695, %v1321_v18  ;;  %v1322_v24 = vadd.f32 %v1275_v8, %v3683_v9  ;;  %v1324_v19 = vadd.f32 %v1316_v29, %v3684_v3  ;;  %v3301_v29 = vld [vmem:[#allocation8 + $0x68] ss:$16 sps:$4 sm:$0xff]   ;;  %v3307_v9 = vld [vmem:[#allocation8 + $0x4c] ss:$16 sps:$4 sm:$0xff]  }
 0x529   :  { %v1277_v36 = vpop.f32.mrf.mxu0  ;;  %v1318_v35 = vpop.f32.mrf.mxu1  ;;  %v3328_v3 = vld [vmem:[#allocation8 + $0x4] ss:$16 sps:$4 sm:$0xff]  }
 0x52a   :  { %2272 = vpow2.f32 %v2088_v61  ;;  %v2089_v28 = vmul.f32 -1.442695, %v1322_v24  ;;  %v2090_v45 = vmul.f32 -1.442695, %v1324_v19  ;;  %v3304_v61 = vld [vmem:[#allocation8 + $0x44] ss:$16 sps:$4 sm:$0xff]  }
 0x52b   :  { %v1278_v33 = vpop.f32.mrf.mxu0  ;;  %v1319_v54 = vpop.f32.mrf.mxu1  ;;  %v3310_v24 = vld [vmem:[#allocation8 + $0x40] ss:$16 sps:$4 sm:$0xff]   ;;  %v3313_v36 = vld [vmem:[#allocation8 + $0x48] ss:$16 sps:$4 sm:$0xff]   ;;  %v3316_v35 = vld [vmem:[#allocation8 + $0x24] ss:$16 sps:$4 sm:$0xff]  }
 0x52c   :  { %2274 = vpow2.f32 %v2089_v28  ;;  %v3319_v28 = vld [vmem:[#allocation8 + $0x2c] ss:$16 sps:$4 sm:$0xff]   ;;  %v3322_v33 = vld [vmem:[#allocation8 + $0x20] ss:$16 sps:$4 sm:$0xff]   ;;  %v3325_v54 = vld [vmem:[#allocation8 + $0x28] ss:$16 sps:$4 sm:$0xff]  }
 0x52d   :  { %2276 = vtanh.f32 %v1323_v44  ;;  %v3331_v19 = vld [vmem:[#allocation8 + $0xc] ss:$16 sps:$4 sm:$0xff]   ;;  %v3337_v44 = vld [vmem:[#allocation8 + $0x8] ss:$16 sps:$4 sm:$0xff]  }
 0x52e   :  { %2278 = vpow2.f32 %v2090_v45 }
 0x537   :  { %v2273_v16 = vpop.eup %2272 }
 0x538   :  { %v1328_v0 = vadd.f32 1.0, %v2273_v16 }
 0x539   :  { %v2275_v1 = vpop.eup %2274 }
 0x53a   :  { %2280 = vrcp.f32 %v1328_v0  ;;  %v1334_v25 = vadd.f32 1.0, %v2275_v1  ;;  %v2277_v39 = vpop.eup %2276  ;;  %v3686_v0 = vld [vmem:[#allocation52_spill] sm:$0xff] }
 0x53b   :  { %v2279_v40 = vpop.eup %2278 }
 0x53c   :  { %2282 = vrcp.f32 %v1334_v25  ;;  %v1341_v32 = vadd.f32 1.0, %v2279_v40 }
 0x53e   :  { %2284 = vrcp.f32 %v1341_v32 }
 0x547   :  { %v2281_v42 = vpop.eup %2280 }
 0x548   :  { %v1345_v27 = vmul.f32 %v2281_v42, %v2277_v39  ;;  %v3687_v42 = vsel %vm2707_vm3, %v2855_v58, %v2850_v15 }
 0x549   :  { %v2283_v31 = vpop.eup %2282 }
 0x54a   :  { %v1344_v6 = vmul.f32 %v2283_v31, %v3179_v38  ;;  %v3298_v38 = vld [vmem:[#allocation8 + $0x60] ss:$16 sps:$4 sm:$0xff]  }
 0x54b   :  { %v2285_v7 = vpop.eup %2284 }
 0x54c   :  { %v3273_v18 = vadd.f32 %v1345_v27, %v1344_v6 }
 0x54e   :  { %2286 = vtanh.f32 %v3273_v18 }
 0x55b   :  { %v2287_v56 = vpop.eup %2286 }
 0x55c   :  { %v3276_v10 = vmul.f32 %v2287_v56, %v2285_v7 }
 0x55e   :  { %v1353_v8 = vpack.c.bf16 %v3276_v10, %v3276_v10 }
 0x560   :  { %1387 = vmatmul.mubr.bf16.vlgmr.msra.gmra.mxu0 %v1353_v8  ;;  %1428 = vmatmul.mubr.bf16.vlgmr.msra.gmra.mxu1 %v1353_v8  ;;  %v3689_v8 = vsel %vm2697_vm2, %v2841_v63, %v2832_v60 }
 0x561   :  { %1470 = vmatpush1.bf16.msra.mxu0 %v3186_v43  ;;  %1511 = vmatpush1.bf16.msra.mxu1 %v3189_v46 }
 0x562   :  { %1471 = vmatprep.subr.bf16.mxu0 %v3192_v37  ;;  %1512 = vmatprep.subr.bf16.mxu1 %v3195_v47 }
 0x563   :  { %1501 = vmatprep.mubr.bf16.mxu0 %v3646_v26  ;;  %1542 = vmatprep.mubr.bf16.mxu1 %v3646_v26 }
 0x565   :  { %1472 = vmatpush1.bf16.msra.mxu0 %v3200_v48  ;;  %1513 = vmatpush1.bf16.msra.mxu1 %v3203_v49 }
 0x566   :  { %1473 = vmatprep.subr.bf16.mxu0 %v3206_v50  ;;  %1514 = vmatprep.subr.bf16.mxu1 %v3209_v51 }
 0x569   :  { %1474 = vmatpush1.bf16.msra.mxu0 %v3212_v52  ;;  %1515 = vmatpush1.bf16.msra.mxu1 %v3215_v4 }
 0x56a   :  { %1475 = vmatprep.subr.bf16.mxu0 %v3218_v5  ;;  %1516 = vmatprep.subr.bf16.mxu1 %v3221_v57 }
 0x56d   :  { %1476 = vmatpush1.bf16.msra.mxu0 %v3224_v23  ;;  %1517 = vmatpush1.bf16.msra.mxu1 %v3227_v53 }
 0x56e   :  { %1477 = vmatprep.subr.bf16.mxu0 %v3230_v30  ;;  %1518 = vmatprep.subr.bf16.mxu1 %v3233_v17 }
 0x571   :  { %1478 = vmatpush1.bf16.msra.mxu0 %v3298_v38  ;;  %1519 = vmatpush1.bf16.msra.mxu1 %v3301_v29 }
 0x572   :  { %1479 = vmatprep.subr.bf16.mxu0 %v3304_v61  ;;  %1520 = vmatprep.subr.bf16.mxu1 %v3307_v9 }
 0x575   :  { %1480 = vmatpush1.bf16.msra.mxu0 %v3310_v24  ;;  %1521 = vmatpush1.bf16.msra.mxu1 %v3313_v36 }
 0x576   :  { %1481 = vmatprep.subr.bf16.mxu0 %v3316_v35  ;;  %1522 = vmatprep.subr.bf16.mxu1 %v3319_v28 }
 0x579   :  { %1482 = vmatpush1.bf16.msra.mxu0 %v3322_v33  ;;  %1523 = vmatpush1.bf16.msra.mxu1 %v3325_v54 }
 0x57a   :  { %1483 = vmatprep.subr.bf16.mxu0 %v3328_v3  ;;  %1524 = vmatprep.subr.bf16.mxu1 %v3331_v19 }
 0x57d   :  { %1484 = vmatpush1.bf16.msra.mxu0 %v3334_v2  ;;  %1525 = vmatpush1.bf16.msra.mxu1 %v3337_v44 }
 0x57e   :  { %1584 = vmatprep.subr.bf16.mxu0 %v3250_v55  ;;  %1625 = vmatprep.subr.bf16.mxu1 %v3253_v22  ;;  %v3688_v22 = vsel %vm2714_vm4, %v2870_v59, %v2865_v62 }
 0x620   :  { %v1388_v45 = vpop.f32.mrf.mxu0  ;;  %v1429_v16 = vpop.f32.mrf.mxu1 }
 0x621   :  { %v1436_v1 = vadd.f32 %v1388_v45, %v3686_v0  ;;  %v1438_v58 = vadd.f32 %v1429_v16, %v3689_v8 }
 0x622   :  { %v1390_v25 = vpop.f32.mrf.mxu0  ;;  %v1431_v39 = vpop.f32.mrf.mxu1 }
 0x623   :  { %v2091_v40 = vmul.f32 -1.442695, %v1436_v1  ;;  %v1437_v27 = vadd.f32 %v1390_v25, %v3687_v42  ;;  %v1439_v56 = vadd.f32 %v1431_v39, %v3688_v22 }
 0x624   :  { %v1392_v31 = vpop.f32.mrf.mxu0  ;;  %v1433_v32 = vpop.f32.mrf.mxu1 }
 0x625   :  { %2288 = vpow2.f32 %v2091_v40  ;;  %v2092_v6 = vmul.f32 -1.442695, %v1437_v27  ;;  %v2093_v15 = vmul.f32 -1.442695, %v1439_v56 }
 0x626   :  { %v1393_v55 = vpop.f32.mrf.mxu0  ;;  %v1434_v7 = vpop.f32.mrf.mxu1 }
 0x627   :  { %2290 = vpow2.f32 %v2092_v6 }
 0x628   :  { %2292 = vtanh.f32 %v1438_v58  ;;  %v3697_v58 = vld [vmem:[#allocation55_spill] sm:$0xff] }
 0x629   :  { %2294 = vpow2.f32 %v2093_v15 }
 0x632   :  { %v2289_v45 = vpop.eup %2288 }
 0x633   :  { %v1443_v0 = vadd.f32 1.0, %v2289_v45 }
 0x634   :  { %v2291_v1 = vpop.eup %2290 }
 0x635   :  { %2296 = vrcp.f32 %v1443_v0  ;;  %v1449_v25 = vadd.f32 1.0, %v2291_v1  ;;  %v2293_v40 = vpop.eup %2292 }
 0x636   :  { %v2295_v42 = vpop.eup %2294 }
 0x637   :  { %2298 = vrcp.f32 %v1449_v25  ;;  %v1456_v39 = vadd.f32 1.0, %v2295_v42  ;;  %v3698_v25 = vld [vmem:[#allocation38_spill] sm:$0xff] }
 0x639   :  { %2300 = vrcp.f32 %v1456_v39 }
 0x642   :  { %v2297_v27 = vpop.eup %2296 }
 0x643   :  { %v1460_v62 = vmul.f32 %v2297_v27, %v2293_v40  ;;  %v3699_v40 = vld [vmem:[#allocation37_spill] sm:$0xff] }
 0x644   :  { %v2299_v59 = vpop.eup %2298  ;;  %v3700_v42 = vsel %vm2707_vm3, %v3698_v25, %v3699_v40  ;;  %v3710_v40 = vld [vmem:[#allocation33_spill] sm:$0xff] }
 0x645   :  { %v1459_v31 = vmul.f32 %v2299_v59, %v3273_v18 }
 0x646   :  { %v2301_v60 = vpop.eup %2300 }
 0x647   :  { %v3359_v32 = vadd.f32 %v1460_v62, %v1459_v31 }
 0x649   :  { %2302 = vtanh.f32 %v3359_v32 }
 0x656   :  { %v2303_v63 = vpop.eup %2302 }
 0x657   :  { %v3362_v16 = vmul.f32 %v2303_v63, %v2301_v60  ;;  %v3701_v60 = vld [vmem:[#allocation41_spill] sm:$0xff]  ;;  %v3702_v63 = vld [vmem:[#allocation39_spill] sm:$0xff] }
 0x659   :  { %v1468_v6 = vpack.c.bf16 %v3362_v16, %v3362_v16 }
 0x65b   :  { %1502 = vmatmul.mubr.bf16.vlgmr.msra.gmra.mxu0 %v1468_v6  ;;  %1543 = vmatmul.mubr.bf16.vlgmr.msra.gmra.mxu1 %v1468_v6  ;;  %v3703_v6 = vsel %vm2714_vm4, %v3701_v60, %v3702_v63 }
 0x65c   :  { %1585 = vmatpush1.bf16.msra.mxu0 %v3186_v43  ;;  %1626 = vmatpush1.bf16.msra.mxu1 %v3189_v46  ;;  %v3690_v46 = vld [vmem:[#allocation54_spill] sm:$0xff] }
 0x65d   :  { %1586 = vmatprep.subr.bf16.mxu0 %v3192_v37  ;;  %1627 = vmatprep.subr.bf16.mxu1 %v3195_v47 }
 0x65e   :  { %1616 = vmatprep.mubr.bf16.mxu0 %v3646_v26  ;;  %1657 = vmatprep.mubr.bf16.mxu1 %v3646_v26 }
 0x660   :  { %1587 = vmatpush1.bf16.msra.mxu0 %v3200_v48  ;;  %1628 = vmatpush1.bf16.msra.mxu1 %v3203_v49 }
 0x661   :  { %1588 = vmatprep.subr.bf16.mxu0 %v3206_v50  ;;  %1629 = vmatprep.subr.bf16.mxu1 %v3209_v51  ;;  %v3691_v50 = vld [vmem:[#allocation42_spill] sm:$0xff] }
 0x662   :  { %v3692_v51 = vsel %vm2707_vm3, %v2795_v14, %v3691_v50 }
 0x664   :  { %1589 = vmatpush1.bf16.msra.mxu0 %v3212_v52  ;;  %1630 = vmatpush1.bf16.msra.mxu1 %v3215_v4 }
 0x665   :  { %1590 = vmatprep.subr.bf16.mxu0 %v3218_v5  ;;  %1631 = vmatprep.subr.bf16.mxu1 %v3221_v57 }
 0x668   :  { %1591 = vmatpush1.bf16.msra.mxu0 %v3224_v23  ;;  %1632 = vmatpush1.bf16.msra.mxu1 %v3227_v53 }
 0x669   :  { %1592 = vmatprep.subr.bf16.mxu0 %v3230_v30  ;;  %1633 = vmatprep.subr.bf16.mxu1 %v3233_v17  ;;  %v3693_v30 = vld [vmem:[#allocation43_spill] sm:$0xff]  ;;  %v3694_v17 = vld [vmem:[#allocation44_spill] sm:$0xff] }
 0x66a   :  { %v3695_v18 = vsel %vm2714_vm4, %v3693_v30, %v3694_v17 }
 0x66c   :  { %1593 = vmatpush1.bf16.msra.mxu0 %v3298_v38  ;;  %1634 = vmatpush1.bf16.msra.mxu1 %v3301_v29  ;;  %v3696_v29 = vsel %vm2697_vm2, %v2783_v20, %v2791_v12 }
 0x66d   :  { %1594 = vmatprep.subr.bf16.mxu0 %v3304_v61  ;;  %1635 = vmatprep.subr.bf16.mxu1 %v3307_v9 }
 0x670   :  { %1595 = vmatpush1.bf16.msra.mxu0 %v3310_v24  ;;  %1636 = vmatpush1.bf16.msra.mxu1 %v3313_v36 }
 0x671   :  { %1596 = vmatprep.subr.bf16.mxu0 %v3316_v35  ;;  %1637 = vmatprep.subr.bf16.mxu1 %v3319_v28 }
 0x674   :  { %1597 = vmatpush1.bf16.msra.mxu0 %v3322_v33  ;;  %1638 = vmatpush1.bf16.msra.mxu1 %v3325_v54 }
 0x675   :  { %1598 = vmatprep.subr.bf16.mxu0 %v3328_v3  ;;  %1639 = vmatprep.subr.bf16.mxu1 %v3331_v19 }
 0x678   :  { %1599 = vmatpush1.bf16.msra.mxu0 %v3334_v2  ;;  %1640 = vmatpush1.bf16.msra.mxu1 %v3337_v44 }
 0x71b   :  { %v1503_v26 = vpop.f32.mrf.mxu0  ;;  %v1544_v43 = vpop.f32.mrf.mxu1 }
 0x71c   :  { %v1551_v37 = vadd.f32 %v1503_v26, %v3690_v46  ;;  %v1553_v14 = vadd.f32 %v1544_v43, %v3696_v29  ;;  %v3705_v43 = vld [vmem:[#allocation35_spill] sm:$0xff] }
 0x71d   :  { %v1505_v47 = vpop.f32.mrf.mxu0  ;;  %v1546_v48 = vpop.f32.mrf.mxu1  ;;  %v3706_v46 = vsel %vm2697_vm2, %v3704_v11, %v3705_v43 }
 0x71e   :  { %v2094_v49 = vmul.f32 -1.442695, %v1551_v37  ;;  %v1552_v52 = vadd.f32 %v1505_v47, %v3692_v51  ;;  %v1554_v38 = vadd.f32 %v1546_v48, %v3695_v18 }
 0x71f   :  { %v1507_v4 = vpop.f32.mrf.mxu0  ;;  %v1548_v5 = vpop.f32.mrf.mxu1 }
 0x720   :  { %2304 = vpow2.f32 %v2094_v49  ;;  %v2095_v57 = vmul.f32 -1.442695, %v1552_v52  ;;  %v2096_v61 = vmul.f32 -1.442695, %v1554_v38  ;;  %v2479_v52 = vmov 1966171168  }
 0x721   :  { %v1508_v23 = vpop.f32.mrf.mxu0  ;;  %v1549_v53 = vpop.f32.mrf.mxu1  ;;  %v1706_v4 = vunpack.c.l.s4 %v2479_v52  ;;  %v3707_v38 = vld [vmem:[#allocation32_spill] sm:$0xff] }
 0x722   :  { %2306 = vpow2.f32 %v2095_v57 }
 0x723   :  { %2308 = vtanh.f32 %v1553_v14  ;;  %v1707_v53 = vunpack.c.0.s8 %v1706_v4 }
 0x724   :  { %2310 = vpow2.f32 %v2096_v61  ;;  %v1699_v61 = vsel %vm473_vm0, %v3276_v10, %v3182_v41 }
 0x725   :  { %v3432_v29 = vsub.s32 %v1707_v53, %v3707_v38 }
 0x72d   :  { %v2305_v9 = vpop.eup %2304 }
 0x72e   :  { %v1558_v24 = vadd.f32 1.0, %v2305_v9  ;;  %v1700_v9 = vsel %vm473_vm0, %v3182_v41, %v3276_v10 }
 0x72f   :  { %v2307_v36 = vpop.eup %2306 }
 0x730   :  { %2312 = vrcp.f32 %v1558_v24  ;;  %v1564_v35 = vadd.f32 1.0, %v2307_v36  ;;  %v2309_v28 = vpop.eup %2308  ;;  %v1782_v24 = vrot.slane %v1699_v61, %v3432_v29  ;;  %v1805_v36 = vrot.slane %v1700_v9, %v3432_v29 }
 0x731   :  { %v2311_v33 = vpop.eup %2310 }
 0x732   :  { %2314 = vrcp.f32 %v1564_v35  ;;  %v1571_v2 = vadd.f32 1.0, %v2311_v33  ;;  %v1698_v35 = vsel %vm473_vm0, %v3362_v16, %v3124_v13  ;;  %v3709_v33 = vld [vmem:[#allocation17_spill] sm:$0xff]  ;;  %v1783_v10 = vcombine.high %v1782_v24, %v1782_v24 }
 0x733   :  { %v1759_v41 = vrot.slane %v1698_v35, %v3432_v29  ;;  %v1984_v35 = vstv %s3484_s15 }
 0x734   :  { %2316 = vrcp.f32 %v1571_v2 }
 0x73d   :  { %v2313_v54 = vpop.eup %2312 }
 0x73e   :  { %v1575_v3 = vmul.f32 %v2313_v54, %v2309_v28  ;;  %v1701_v28 = vsel %vm473_vm0, %v3124_v13, %v3362_v16  ;;  %v1797_v13 = vrot.slane %v1783_v10, %v3432_v29  ;;  %v1813_v16 = vrot.slane %v1805_v36, %v3432_v29 }
 0x73f   :  { %v2315_v19 = vpop.eup %2314 }
 0x740   :  { %v1574_v44 = vmul.f32 %v2315_v19, %v3359_v32  ;;  %v1828_v19 = vrot.slane %v1701_v28, %v3432_v29 }
 0x741   :  { %v2317_v20 = vpop.eup %2316 }
 0x742   :  { %v1576_v55 = vadd.f32 %v1575_v3, %v1574_v44  ;;  %v1806_v3 = vcombine.high %v1805_v36, %v1805_v36  ;;  %v1790_v44 = vrot.slane %v1782_v24, %v3432_v29 }
 0x744   :  { %2318 = vtanh.f32 %v1576_v55 }
 0x751   :  { %v2319_v12 = vpop.eup %2318 }
 0x752   :  { %v1578_v7 = vmul.f32 %v2319_v12, %v2317_v20  ;;  %v1820_v12 = vrot.slane %v1806_v3, %v3432_v29 }
 0x754   :  { %v1583_v22 = vpack.c.bf16 %v1578_v7, %v1578_v7  ;;  %v1697_v54 = vsel %vm473_vm0, %v1578_v7, %v3709_v33  ;;  %v1702_v20 = vsel %vm473_vm0, %v3709_v33, %v1578_v7 }
 0x755   :  { %v1736_v2 = vrot.slane %v1697_v54, %v3432_v29  ;;  %v1851_v7 = vrot.slane %v1702_v20, %v3432_v29  ;;  %v2368_v54 = vld [vmem:[#allocation2] sm:$0xff] }
 0x756   :  { %1617 = vmatmul.mubr.bf16.vlgmr.msra.gmra.mxu0 %v1583_v22  ;;  %1658 = vmatmul.mubr.bf16.vlgmr.msra.gmra.mxu1 %v1583_v22 }
 0x816   :  { %v1618_v56 = vpop.f32.mrf.mxu0  ;;  %v1659_v8 = vpop.f32.mrf.mxu1 }
 0x817   :  { %v1666_v15 = vadd.f32 %v1618_v56, %v3697_v58  ;;  %v1668_v37 = vadd.f32 %v1659_v8, %v3706_v46  ;;  %v1737_v56 = vcombine.high %v1736_v2, %v1736_v2  ;;  %v1829_v8 = vcombine.high %v1828_v19, %v1828_v19 }
 0x818   :  { %v1620_v45 = vpop.f32.mrf.mxu0  ;;  %v1661_v0 = vpop.f32.mrf.mxu1 }
 0x819   :  { %v2097_v1 = vmul.f32 -1.442695, %v1666_v15  ;;  %v1667_v27 = vadd.f32 %v1620_v45, %v3700_v42  ;;  %v1669_v26 = vadd.f32 %v1661_v0, %v3703_v6  ;;  %v1767_v15 = vrot.slane %v1759_v41, %v3432_v29 }
 0x81a   :  { %v1622_v62 = vpop.f32.mrf.mxu0  ;;  %v1663_v59 = vpop.f32.mrf.mxu1  ;;  %v1836_v45 = vrot.slane %v1828_v19, %v3432_v29  ;;  %v1913_v42 = vrot.slane %v1790_v44, %v3710_v40  ;;  %v1843_v63 = vrot.slane %v1829_v8, %v3432_v29  ;;  %v2369_v44 = vld [vmem:[#allocation2 + $0x8] sm:$0xff] }
 0x81b   :  { %2320 = vpow2.f32 %v2097_v1  ;;  %v2098_v39 = vmul.f32 -1.442695, %v1667_v27  ;;  %v2099_v47 = vmul.f32 -1.442695, %v1669_v26  ;;  %v1744_v1 = vrot.slane %v1736_v2, %v3432_v29 }
 0x81c   :  { %v1623_v31 = vpop.f32.mrf.mxu0  ;;  %v1664_v32 = vpop.f32.mrf.mxu1  ;;  %v1917_v27 = vrot.slane %v1797_v13, %v3710_v40  ;;  %v1923_v62 = vrot.slane %v1813_v16, %v3710_v40  ;;  %v1927_v59 = vrot.slane %v1820_v12, %v3710_v40  ;;  %v1903_v11 = vrot.slane %v1767_v15, %v3710_v40 }
 0x81d   :  { %2322 = vpow2.f32 %v2098_v39  ;;  %v1751_v39 = vrot.slane %v1737_v56, %v3432_v29  ;;  %v3711_v31 = vld [vmem:[#allocation56_spill] sm:$0xff]  ;;  %v1933_v43 = vrot.slane %v1836_v45, %v3710_v40  ;;  %v1893_v46 = vrot.slane %v1744_v1, %v3710_v40 }
 0x81e   :  { %2324 = vtanh.f32 %v1668_v37  ;;  %v1852_v37 = vcombine.high %v1851_v7, %v1851_v7  ;;  %v1937_v52 = vrot.slane %v1843_v63, %v3710_v40 }
 0x81f   :  { %2326 = vpow2.f32 %v2099_v47 }
 0x828   :  { %v2321_v48 = vpop.eup %2320 }
 0x829   :  { %v1673_v49 = vadd.f32 1.0, %v2321_v48 }
 0x82a   :  { %v2323_v50 = vpop.eup %2322 }
 0x82b   :  { %2328 = vrcp.f32 %v1673_v49  ;;  %v1679_v51 = vadd.f32 1.0, %v2323_v50  ;;  %v2325_v21 = vpop.eup %2324 }
 0x82c   :  { %v2327_v5 = vpop.eup %2326 }
 0x82d   :  { %2330 = vrcp.f32 %v1679_v51  ;;  %v1686_v30 = vadd.f32 1.0, %v2327_v5  ;;  %v1859_v51 = vrot.slane %v1851_v7, %v3432_v29 }
 0x82f   :  { %2332 = vrcp.f32 %v1686_v30  ;;  %v1943_v38 = vrot.slane %v1859_v51, %v3710_v40 }
 0x838   :  { %v2329_v57 = vpop.eup %2328 }
 0x839   :  { %v1690_v23 = vmul.f32 %v2329_v57, %v2325_v21  ;;  %v1897_v21 = vrot.slane %v1751_v39, %v3710_v40 }
 0x83a   :  { %v2331_v34 = vpop.eup %2330 }
 0x83b   :  { %v1689_v17 = vmul.f32 %v2331_v34, %v1576_v55  ;;  %v1760_v55 = vcombine.high %v1759_v41, %v1759_v41 }
 0x83c   :  { %v2333_v22 = vpop.eup %2332 }
 0x83d   :  { %v1691_v18 = vadd.f32 %v1690_v23, %v1689_v17  ;;  %v1774_v0 = vrot.slane %v1760_v55, %v3432_v29  ;;  %v1866_v23 = vrot.slane %v1852_v37, %v3432_v29 }
 0x83f   :  { %2334 = vtanh.f32 %v1691_v18  ;;  %v1907_v47 = vrot.slane %v1774_v0, %v3710_v40  ;;  %v1981_v18 = vstv %s3470_s3 }
 0x840   :  { %v1982_v41 = vmul.f32 %v2368_v54, %v1981_v18  ;;  %v1983_v55 = vmul.f32 %v2369_v44, %v1981_v18 }
 0x84c   :  { %v2335_v58 = vpop.eup %2334 }
 0x84d   :  { %v1693_v25 = vmul.f32 %v2335_v58, %v2333_v22 }
 0x84f   :  { %v1696_v32 = vsel %vm473_vm0, %v1693_v25, %v3711_v31  ;;  %v1703_v60 = vsel %vm473_vm0, %v3711_v31, %v1693_v25 }
 0x850   :  { %v1711_v6 = vrot.slane %v1696_v32, %v3432_v29  ;;  %v1874_v26 = vrot.slane %v1703_v60, %v3432_v29 }
 0x852   :  { %v1712_v48 = vcombine.high %v1711_v6, %v1711_v6  ;;  %v1719_v49 = vrot.slane %v1711_v6, %v3432_v29  ;;  %v1875_v50 = vcombine.high %v1874_v26, %v1874_v26  ;;  %v1882_v5 = vrot.slane %v1874_v26, %v3432_v29 }
 0x854   :  { %v1726_v4 = vrot.slane %v1712_v48, %v3432_v29  ;;  %v1961_v57 = vsel %vm1960_vm5, %v1719_v49, %v1893_v46  ;;  %v1889_v53 = vrot.slane %v1875_v50, %v3432_v29  ;;  %v1953_v9 = vrot.slane %v1882_v5, %v3710_v40 }
 0x855   :  { %v1964_v34 = vsel %vm1963_vm6, %v1961_v57, %v1903_v11  ;;  %v1947_v29 = vrot.slane %v1866_v23, %v3710_v40 }
 0x856   :  { %v1962_v30 = vsel %vm1960_vm5, %v1726_v4, %v1897_v21  ;;  %v1967_v17 = vsel %vm1966_vm7, %v1964_v34, %v1913_v42  ;;  %v1957_v10 = vrot.slane %v1889_v53, %v3710_v40 }
 0x857   :  { %v1965_v14 = vsel %vm1963_vm6, %v1962_v30, %v1907_v47  ;;  %v1970_v61 = vsel %vm1969_vm8, %v1967_v17, %v1923_v62 }
 0x858   :  { %v1968_v24 = vsel %vm1966_vm7, %v1965_v14, %v1917_v27  ;;  %v1973_v36 = vsel %vm1972_vm9, %v1970_v61, %v1933_v43 }
 0x859   :  { %v1971_v28 = vsel %vm1969_vm8, %v1968_v24, %v1927_v59  ;;  %v1976_v33 = vsel %vm1975_vm10, %v1973_v36, %v1943_v38 }
 0x85a   :  { %v1974_v3 = vsel %vm1972_vm9, %v1971_v28, %v1937_v52  ;;  %v1979_v19 = vsel %vm1978_vm11, %v1976_v33, %v1953_v9 }
 0x85b   :  { %v1977_v2 = vsel %vm1975_vm10, %v1974_v3, %v1947_v29  ;;  %v1985_v20 = vmul.f32 %v1984_v35, %v1979_v19 }
 0x85c   :  { %v1980_v13 = vsel %vm1978_vm11, %v1977_v2, %v1957_v10 }
 0x85d   :  { %v1986_v16 = vmul.f32 %v1984_v35, %v1980_v13  ;;  %v1987_v12 = vadd.f32 %v1985_v20, %v1982_v41 }
 0x85f   :  { %v1988_v22 = vadd.f32 %v1986_v16, %v1983_v55  ;;  %1989 = vst [vmem:[#allocation10] sm:$0xff] %v1987_v12 }
 0x861   :  { %1990 = vst [vmem:[#allocation10 + $0x8] sm:$0xff] %v1988_v22 }
 0x862   :  { %2453 = shalt.err (!%p2450_p10)
}
 0x863   :  { %2002 = dma.vmem_to_hbm [thread:$0]  %s1997_s17, 256, %s3531_s5, [#allocation4], %s2474_s28, %s2474_s28, %s2475_s29  }
 0x864   :  { %2468 = dma.done.wait [#allocation4], 256  }
 0x865   :  { %2469 = vsyncadd [#allocation4], 4294967040 }
 0x866   :  { %2006 = vsyncpa [#allocation3], 1 }
 0x867   :  { %2007 = vsyncpa [#allocation7], 1 }
 0x868   :  { %2008 = vsyncpa [#allocation4], 1 }
 0x869   :  { %2009 = vsyncpa [#allocation5], 1 }

</bundles_post_ra>
